<compile_context>
chip_gen: v6e
topology: v6e:2x2x1
jax: 0.10.0
libtpu: 0.0.40
codegen_flags: <defaults>
</compile_context>

<pallas_src>
import functools

import jax
import jax.numpy as jnp
from jax.experimental import pallas as pl
from jax.experimental.pallas import tpu as pltpu

LANE = 128


def _round_up(n, m):
    return ((n + m - 1) // m) * m


def _pick_row_tile(H, W):
    """Largest divisor R of H with R*W <= 1024 spatial positions per tile and (when
    possible) >=2 row tiles, so the (batch, row) grid has enough parallel steps to
    pipeline DMA and to shard across TensorCores, while fitting v7x VMEM budgets."""
    divisors = [r for r in range(1, H + 1) if H % r == 0]
    ok = [r for r in divisors if r * W <= 1024 and H // r >= 2]
    if ok:
        return max(ok)
    ok = [r for r in divisors if H // r >= 2]
    return max(ok) if ok else H


def _bottleneck_kernel(x_prev_ref, x_cur_ref, x_next_ref,
                       w1_ref, b1_ref, w2_ref, b2_ref, w3_ref, b3_ref,
                       out_ref, *, H, W, R):
    t = pl.program_id(1)
    fpp = w1_ref.shape[1]                      # padded first_planes (multiple of 128)

    # ---- conv1 (1x1, bn1 scale folded) + shift + ReLU on the (R+2)-row halo strip --
    xb = jnp.concatenate([x_prev_ref[0].astype(jnp.bfloat16),
                          x_cur_ref[0].astype(jnp.bfloat16),
                          x_next_ref[0].astype(jnp.bfloat16)], axis=0)
    y1 = jnp.dot(xb, w1_ref[...], preferred_element_type=jnp.float32)
    y1 = jnp.maximum(y1 + b1_ref[...], 0.0)    # ((R+2)*W, fpp) f32

    # conv2's zero padding applies to its *activation* input: zero the halo rows that
    # fall outside the image (first/last row tile).  Strip row p = image row t*R+p//W-1.
    pos = jax.lax.broadcasted_iota(jnp.int32, ((R + 2) * W, 1), 0)
    lo = (1 - t * R) * W
    hi = (H + 1 - t * R) * W
    y1 = jnp.where((pos >= lo) & (pos < hi), y1, 0.0)
    y1 = y1.reshape(R + 2, W, fpp)

    # ---- conv2 (3x3, stride 1, pad 1, bn2 folded) ----------------------------------
    # dx (column) taps: zero-edge shifts of y1 along W, then cast to bf16.
    # dy (row) taps: lane-aligned channel concat of leading-row slices (bf16).
    # One accumulated MXU matmul (K = 3*fpp) per dx tap — no 9*C strip is materialized.
    # TODO(synk): the column shift could use pltpu.roll + an iota mask once packed-bf16
    #   sublane rotates are universally supported; the f32 concat pattern is kept for
    #   lowering safety (the shifted buffers are only fpp lanes wide).
    zcol = jnp.zeros((R + 2, 1, fpp), jnp.float32)
    y1_m = jnp.concatenate([zcol, y1[:, :-1]], axis=1).astype(jnp.bfloat16)  # col j-1
    y1_c = y1.astype(jnp.bfloat16)                                           # col j
    y1_p = jnp.concatenate([y1[:, 1:], zcol], axis=1).astype(jnp.bfloat16)   # col j+1

    def dy_taps(a):  # (R+2, W, fpp) bf16 -> (R*W, 3*fpp) bf16 (rows = output rows)
        return jnp.concatenate([a[0:R], a[1:R + 1], a[2:R + 2]],
                               axis=-1).reshape(R * W, 3 * fpp)

    y2 = jnp.dot(dy_taps(y1_m), w2_ref[0], preferred_element_type=jnp.float32)
    y2 = y2 + jnp.dot(dy_taps(y1_c), w2_ref[1], preferred_element_type=jnp.float32)
    y2 = y2 + jnp.dot(dy_taps(y1_p), w2_ref[2], preferred_element_type=jnp.float32)
    y2 = jnp.maximum(y2 + b2_ref[...], 0.0).astype(jnp.bfloat16)   # (R*W, width_pad)

    # ---- conv3 (1x1, bn3 folded) + shift + identity shortcut + ReLU ----------------
    y3 = jnp.dot(y2, w3_ref[...], preferred_element_type=jnp.float32)
    # shortcut is re-read here rather than held live across the matmuls above
    out_ref[0] = jnp.maximum(y3 + b3_ref[...] + x_cur_ref[0], 0.0).astype(out_ref.dtype)


def prepare_params(params, cpad, fp_pad, width_pad):
    """Fold BN scales into conv weights, pad every channel dim to 128-lane multiples,
    reorganize the 3x3 weights into per-dx (3*fp_pad, width_pad) slabs, cast to bf16."""
    w1, (s1, b1), w2, (s2, b2), w3, (s3, b3) = params
    cin, fp = w1.shape
    width, cout = w3.shape

    w1f = w1 * s1.reshape(1, fp)                                      # (cin, fp)
    w2f = w2.reshape(3, 3, fp, width) * s2.reshape(1, 1, 1, width)    # (kh,kw,fp,width)
    w3f = w3 * s3.reshape(1, cout)                                    # (width, cout)

    # Zero pads everywhere keep padded channels exactly zero through relu(0 + 0).
    w1p = jnp.zeros((cpad, fp_pad), jnp.float32).at[:cin, :fp].set(w1f)
    b1p = jnp.zeros((1, fp_pad), jnp.float32).at[:, :fp].set(b1.reshape(1, fp))
    w2p = jnp.zeros((3, 3, fp_pad, width_pad), jnp.float32).at[:, :, :fp, :width].set(w2f)
    # One slab per kw tap; slab rows ordered (kh, channel) to match dy_taps' layout.
    w2p = jnp.transpose(w2p, (1, 0, 2, 3)).reshape(3, 3 * fp_pad, width_pad)
    b2p = jnp.zeros((1, width_pad), jnp.float32).at[:, :width].set(b2.reshape(1, width))
    w3p = jnp.zeros((width_pad, cpad), jnp.float32).at[:width, :cout].set(w3f)
    b3p = jnp.zeros((1, cpad), jnp.float32).at[:, :cout].set(b3.reshape(1, cout))

    return (w1p.astype(jnp.bfloat16), b1p,
            w2p.astype(jnp.bfloat16), b2p,
            w3p.astype(jnp.bfloat16), b3p)


def sparse_bottleneck(x, params, *, row_tile=None):
    """x: (N, H, W, Cin) NHWC with Cin == planes * 4 (identity shortcut)."""
    w1 = params[0]
    w3 = params[4]
    N, H, W, cin = x.shape
    fp = w1.shape[1]
    width, cout = w3.shape
    assert cin == cout, "identity shortcut requires inplanes == planes*4"
    assert W % 8 == 0, "TODO(synk): W not a multiple of 8 needs a padded-W layout"

    cpad = _round_up(cin, LANE)
    fp_pad = _round_up(fp, LANE)
    width_pad = _round_up(width, LANE)

    R = row_tile if row_tile is not None else _pick_row_tile(H, W)
    assert H % R == 0
    nt = H // R

    w1p, b1p, w2p, b2p, w3p, b3p = prepare_params(params, cpad, fp_pad, width_pad)

    # Lane-dense channel-padded activations; the extra HBM pad pass is skipped
    # entirely when Cin is already a multiple of 128 (real bottleneck widths).
    if cpad != cin:
        x = jnp.pad(x, ((0, 0), (0, 0), (0, 0), (0, cpad - cin)))
    xp = x.reshape(N, H * W, cpad)

    kernel = functools.partial(_bottleneck_kernel, H=H, W=W, R=R)

    def const_spec(arr):
        # Constant index_map: the block is DMA'd once and stays VMEM-resident.
        # TODO(synk): mark pipeline_mode=pl.Buffered(1) to drop the dead second
        #   pipeline buffer once single-buffered constant operands are universal.
        nd = arr.ndim
        return pl.BlockSpec(arr.shape, lambda b, t, _nd=nd: (0,) * _nd)

    out = pl.pallas_call(
        kernel,
        out_shape=jax.ShapeDtypeStruct((N, H * W, cpad), x.dtype),
        grid=(N, nt),
        in_specs=[
            # 1-row halo above, R-row body, 1-row halo below (edge-clamped; the
            # kernel zeroes halo rows that fall outside the image).
            pl.BlockSpec((1, W, cpad),
                         lambda b, t: (b, jnp.maximum(t * R - 1, 0), 0)),
            pl.BlockSpec((1, R * W, cpad), lambda b, t: (b, t, 0)),
            pl.BlockSpec((1, W, cpad),
                         lambda b, t: (b, jnp.minimum((t + 1) * R, H - 1), 0)),
            const_spec(w1p), const_spec(b1p),
            const_spec(w2p), const_spec(b2p),
            const_spec(w3p), const_spec(b3p),
        ],
        out_specs=pl.BlockSpec((1, R * W, cpad), lambda b, t: (b, t, 0)),
        compiler_params=pltpu.CompilerParams(
            dimension_semantics=("parallel", "parallel"),
            vmem_limit_bytes=32 * 1024 * 1024),
    )(xp, xp, xp, w1p, b1p, w2p, b2p, w3p, b3p)

    out = out.reshape(N, H, W, cpad)
    return out[..., :cout] if cpad != cout else out


def init_params(key, inplanes, planes, base_width=64, reduce_first=1):
    """Deterministic synthetic parameters with the same shapes as the module."""
    expansion = 4
    width = int(planes * (base_width / 64.0))
    first_planes = width // reduce_first
    outplanes = planes * expansion
    keys = jax.random.split(key, 16)

    # PyTorch conv weights are OIHW; convert to the matmul layouts.
    w1_oihw = 0.1 * jax.random.normal(keys[0], (first_planes, inplanes, 1, 1), jnp.float32)
    w2_oihw = 0.1 * jax.random.normal(keys[1], (width, first_planes, 3, 3), jnp.float32)
    w3_oihw = 0.1 * jax.random.normal(keys[2], (outplanes, width, 1, 1), jnp.float32)
    w1 = w1_oihw[:, :, 0, 0].T                                  # (Cin, first_planes)
    w2_hwio = jnp.transpose(w2_oihw, (2, 3, 1, 0))              # (3,3,first_planes,width)
    w2 = w2_hwio.reshape(9, first_planes, width)                # taps flattened, HW-major
    w3 = w3_oihw[:, :, 0, 0].T                                  # (width, outplanes)

    def bn_params(kg, kb, km, kv, c, eps=1e-5):
        gamma = 1.0 + 0.1 * jax.random.normal(kg, (c,), jnp.float32)
        beta = 0.1 * jax.random.normal(kb, (c,), jnp.float32)
        mean = 0.1 * jax.random.normal(km, (c,), jnp.float32)
        var = jax.nn.softplus(jax.random.normal(kv, (c,), jnp.float32)) + 0.5
        scale = gamma / jnp.sqrt(var + eps)
        shift = beta - mean * scale
        return scale.reshape(1, c), shift.reshape(1, c)

    bn1 = bn_params(keys[3], keys[4], keys[5], keys[6], first_planes)
    bn2 = bn_params(keys[7], keys[8], keys[9], keys[10], width)
    bn3 = bn_params(keys[11], keys[12], keys[13], keys[14], outplanes)
    return w1, bn1, w2, bn2, w3, bn3


def ref_forward(x, params):
    """Pure-JAX f32 reference (dense NHWC convs + BN scale/shift) for checking."""
    w1, (s1, b1), w2, (s2, b2), w3, (s3, b3) = params
    fp, width = w2.shape[1], w2.shape[2]
    w2_hwio = w2.reshape(3, 3, fp, width)

    def conv(h, w_hwio, padding):
        return jax.lax.conv_general_dilated(
            h, w_hwio, window_strides=(1, 1), padding=padding,
            dimension_numbers=("NHWC", "HWIO", "NHWC"))

    y = conv(x, w1.reshape(1, 1, *w1.shape), "VALID")
    y = jnp.maximum(y * s1 + b1, 0.0)
    y = conv(y, w2_hwio, [(1, 1), (1, 1)])
    y = jnp.maximum(y * s2 + b2, 0.0)
    y = conv(y, w3.reshape(1, 1, *w3.shape), "VALID")
    y = y * s3 + b3
    return jnp.maximum(y + x, 0.0)


if __name__ == "__main__":
    key = jax.random.PRNGKey(0)
    kx, kp = jax.random.split(key)

    N, H, W = 2, 16, 16
    planes = 8
    inplanes = planes * 4          # == outplanes so the identity shortcut is valid
    x = jax.random.normal(kx, (N, H, W, inplanes), jnp.float32)
    params = init_params(kp, inplanes, planes)

    out = sparse_bottleneck(x, params)
    out = jax.block_until_ready(out)

    ref = ref_forward(x, params)
    assert out.shape == (N, H, W, planes * 4), out.shape
    max_err = float(jnp.max(jnp.abs(out - ref)))
    # Kernel runs bf16 weights/activations on the MXU (f32 accumulate); tolerance
    # covers the bf16 rounding of intermediates vs the f32 reference.
    assert jnp.allclose(out, ref, atol=3e-2, rtol=3e-2), max_err
    print("KERNEL_OK")
</pallas_src>

<mosaic_0001>
module attributes {stable_mosaic.version = 11 : i64} {
  func.func @_bottleneck_kernel(%arg0: i32, %arg1: i32, %arg2: memref<1x16x128xf32, #tpu.memory_space<vmem>>, %arg3: memref<1x128x128xf32, #tpu.memory_space<vmem>>, %arg4: memref<1x16x128xf32, #tpu.memory_space<vmem>>, %arg5: memref<128x128xbf16, #tpu.memory_space<vmem>>, %arg6: memref<1x128xf32, #tpu.memory_space<vmem>>, %arg7: memref<3x384x128xbf16, #tpu.memory_space<vmem>>, %arg8: memref<1x128xf32, #tpu.memory_space<vmem>>, %arg9: memref<128x128xbf16, #tpu.memory_space<vmem>>, %arg10: memref<1x128xf32, #tpu.memory_space<vmem>>, %arg11: memref<1x128x128xf32, #tpu.memory_space<vmem>>) attributes {dimension_semantics = [#tpu.dimension_semantics<parallel>, #tpu.dimension_semantics<parallel>], iteration_bounds = array<i64: 2, 2>, scalar_prefetch = 0 : i64, scratch_operands = 0 : i64, tpu.core_type = #tpu.core_type<tc>, window_params = [{transform_indices = @transform_0, window_bounds = array<i64: 1, 16, 128>}, {transform_indices = @transform_1, window_bounds = array<i64: 1, 128, 128>}, {transform_indices = @transform_2, window_bounds = array<i64: 1, 16, 128>}, {pipeline_mode = #tpu.pipeline_mode<synchronous>, transform_indices = @transform_3, window_bounds = array<i64: 128, 128>}, {pipeline_mode = #tpu.pipeline_mode<synchronous>, transform_indices = @transform_4, window_bounds = array<i64: 1, 128>}, {pipeline_mode = #tpu.pipeline_mode<synchronous>, transform_indices = @transform_5, window_bounds = array<i64: 3, 384, 128>}, {pipeline_mode = #tpu.pipeline_mode<synchronous>, transform_indices = @transform_6, window_bounds = array<i64: 1, 128>}, {pipeline_mode = #tpu.pipeline_mode<synchronous>, transform_indices = @transform_7, window_bounds = array<i64: 128, 128>}, {pipeline_mode = #tpu.pipeline_mode<synchronous>, transform_indices = @transform_8, window_bounds = array<i64: 1, 128>}, {transform_indices = @transform_9, window_bounds = array<i64: 1, 128, 128>}]} {
    %c0 = arith.constant 0 : index
    %c0_0 = arith.constant 0 : index
    %c0_1 = arith.constant 0 : index
    %0 = vector.load %arg2[%c0, %c0_0, %c0_1] : memref<1x16x128xf32, #tpu.memory_space<vmem>>, vector<1x16x128xf32>
    %1 = vector.shape_cast %0 : vector<1x16x128xf32> to vector<16x128xf32>
    %2 = arith.truncf %1 : vector<16x128xf32> to vector<16x128xbf16>
    %c0_2 = arith.constant 0 : index
    %c0_3 = arith.constant 0 : index
    %c0_4 = arith.constant 0 : index
    %3 = vector.load %arg3[%c0_2, %c0_3, %c0_4] : memref<1x128x128xf32, #tpu.memory_space<vmem>>, vector<1x128x128xf32>
    %4 = vector.shape_cast %3 : vector<1x128x128xf32> to vector<128x128xf32>
    %5 = arith.truncf %4 : vector<128x128xf32> to vector<128x128xbf16>
    %c0_5 = arith.constant 0 : index
    %c0_6 = arith.constant 0 : index
    %c0_7 = arith.constant 0 : index
    %6 = vector.load %arg4[%c0_5, %c0_6, %c0_7] : memref<1x16x128xf32, #tpu.memory_space<vmem>>, vector<1x16x128xf32>
    %7 = vector.shape_cast %6 : vector<1x16x128xf32> to vector<16x128xf32>
    %8 = arith.truncf %7 : vector<16x128xf32> to vector<16x128xbf16>
    %9 = tpu.concatenate %2, %5, %8 in 0 : vector<16x128xbf16>, vector<128x128xbf16>, vector<16x128xbf16> -> vector<160x128xbf16>
    %c0_8 = arith.constant 0 : index
    %c0_9 = arith.constant 0 : index
    %10 = vector.load %arg5[%c0_8, %c0_9] : memref<128x128xbf16, #tpu.memory_space<vmem>>, vector<128x128xbf16>
    %cst = arith.constant dense<0.000000e+00> : vector<160x128xf32>
    %11 = tpu.matmul %9, %10, %cst {dimension_numbers = #tpu.dot_dimension_numbers<[1], [0], [0], [1], [0, 0, 1, 1], [], []>} : vector<160x128xbf16>, vector<128x128xbf16>, vector<160x128xf32> -> vector<160x128xf32>
    %c0_10 = arith.constant 0 : index
    %c0_11 = arith.constant 0 : index
    %12 = vector.load %arg6[%c0_10, %c0_11] : memref<1x128xf32, #tpu.memory_space<vmem>>, vector<1x128xf32>
    %13 = vector.broadcast %12 : vector<1x128xf32> to vector<160x128xf32>
    %14 = arith.addf %11, %13 : vector<160x128xf32>
    %cst_12 = arith.constant 0.000000e+00 : f32
    %15 = vector.broadcast %cst_12 : f32 to vector<160x128xf32>
    %16 = arith.maximumf %14, %15 : vector<160x128xf32>
    %17 = tpu.iota {dimensions = array<i32: 0>} : vector<160x1xi32>
    %c8_i32 = arith.constant 8 : i32
    %18 = arith.muli %arg1, %c8_i32 : i32
    %c1_i32 = arith.constant 1 : i32
    %19 = arith.subi %c1_i32, %18 : i32
    %c16_i32 = arith.constant 16 : i32
    %20 = arith.muli %19, %c16_i32 : i32
    %c8_i32_13 = arith.constant 8 : i32
    %21 = arith.muli %arg1, %c8_i32_13 : i32
    %c17_i32 = arith.constant 17 : i32
    %22 = arith.subi %c17_i32, %21 : i32
    %c16_i32_14 = arith.constant 16 : i32
    %23 = arith.muli %22, %c16_i32_14 : i32
    %24 = vector.broadcast %20 : i32 to vector<160x1xi32>
    %25 = arith.cmpi sge, %17, %24 : vector<160x1xi32>
    %26 = vector.broadcast %23 : i32 to vector<160x1xi32>
    %27 = arith.cmpi slt, %17, %26 : vector<160x1xi32>
    %28 = arith.andi %25, %27 : vector<160x1xi1>
    %cst_15 = arith.constant 0.000000e+00 : f32
    %29 = vector.shape_cast %28 : vector<160x1xi1> to vector<160x1xi1>
    %30 = vector.broadcast %29 : vector<160x1xi1> to vector<160x128xi1>
    %31 = vector.broadcast %cst_15 : f32 to vector<160x128xf32>
    %32 = arith.select %30, %16, %31 : vector<160x128xi1>, vector<160x128xf32>
    %33 = vector.shape_cast %32 : vector<160x128xf32> to vector<10x16x128xf32>
    %cst_16 = arith.constant 0.000000e+00 : f32
    %34 = vector.broadcast %cst_16 : f32 to vector<10x1x128xf32>
    %35 = vector.extract_strided_slice %33 {offsets = [0, 0, 0], sizes = [10, 15, 128], strides = [1, 1, 1]} : vector<10x16x128xf32> to vector<10x15x128xf32>
    %36 = tpu.concatenate %34, %35 in 1 : vector<10x1x128xf32>, vector<10x15x128xf32> -> vector<10x16x128xf32>
    %37 = arith.truncf %36 : vector<10x16x128xf32> to vector<10x16x128xbf16>
    %38 = arith.truncf %33 : vector<10x16x128xf32> to vector<10x16x128xbf16>
    %39 = vector.extract_strided_slice %33 {offsets = [0, 1, 0], sizes = [10, 15, 128], strides = [1, 1, 1]} : vector<10x16x128xf32> to vector<10x15x128xf32>
    %40 = tpu.concatenate %39, %34 in 1 : vector<10x15x128xf32>, vector<10x1x128xf32> -> vector<10x16x128xf32>
    %41 = arith.truncf %40 : vector<10x16x128xf32> to vector<10x16x128xbf16>
    %42 = vector.extract_strided_slice %37 {offsets = [0, 0, 0], sizes = [8, 16, 128], strides = [1, 1, 1]} : vector<10x16x128xbf16> to vector<8x16x128xbf16>
    %43 = vector.extract_strided_slice %37 {offsets = [1, 0, 0], sizes = [8, 16, 128], strides = [1, 1, 1]} : vector<10x16x128xbf16> to vector<8x16x128xbf16>
    %44 = vector.extract_strided_slice %37 {offsets = [2, 0, 0], sizes = [8, 16, 128], strides = [1, 1, 1]} : vector<10x16x128xbf16> to vector<8x16x128xbf16>
    %45 = tpu.concatenate %42, %43, %44 in 2 : vector<8x16x128xbf16>, vector<8x16x128xbf16>, vector<8x16x128xbf16> -> vector<8x16x384xbf16>
    %46 = vector.shape_cast %45 : vector<8x16x384xbf16> to vector<128x384xbf16>
    %c0_17 = arith.constant 0 : index
    %c0_18 = arith.constant 0 : index
    %c0_19 = arith.constant 0 : index
    %47 = vector.load %arg7[%c0_17, %c0_18, %c0_19] : memref<3x384x128xbf16, #tpu.memory_space<vmem>>, vector<1x384x128xbf16>
    %48 = vector.shape_cast %47 : vector<1x384x128xbf16> to vector<384x128xbf16>
    %cst_20 = arith.constant dense<0.000000e+00> : vector<128x128xf32>
    %49 = tpu.matmul %46, %48, %cst_20 {dimension_numbers = #tpu.dot_dimension_numbers<[1], [0], [0], [1], [0, 0, 1, 1], [], []>} : vector<128x384xbf16>, vector<384x128xbf16>, vector<128x128xf32> -> vector<128x128xf32>
    %50 = vector.extract_strided_slice %38 {offsets = [0, 0, 0], sizes = [8, 16, 128], strides = [1, 1, 1]} : vector<10x16x128xbf16> to vector<8x16x128xbf16>
    %51 = vector.extract_strided_slice %38 {offsets = [1, 0, 0], sizes = [8, 16, 128], strides = [1, 1, 1]} : vector<10x16x128xbf16> to vector<8x16x128xbf16>
    %52 = vector.extract_strided_slice %38 {offsets = [2, 0, 0], sizes = [8, 16, 128], strides = [1, 1, 1]} : vector<10x16x128xbf16> to vector<8x16x128xbf16>
    %53 = tpu.concatenate %50, %51, %52 in 2 : vector<8x16x128xbf16>, vector<8x16x128xbf16>, vector<8x16x128xbf16> -> vector<8x16x384xbf16>
    %54 = vector.shape_cast %53 : vector<8x16x384xbf16> to vector<128x384xbf16>
    %c1 = arith.constant 1 : index
    %c0_21 = arith.constant 0 : index
    %c0_22 = arith.constant 0 : index
    %55 = vector.load %arg7[%c1, %c0_21, %c0_22] : memref<3x384x128xbf16, #tpu.memory_space<vmem>>, vector<1x384x128xbf16>
    %56 = vector.shape_cast %55 : vector<1x384x128xbf16> to vector<384x128xbf16>
    %cst_23 = arith.constant dense<0.000000e+00> : vector<128x128xf32>
    %57 = tpu.matmul %54, %56, %cst_23 {dimension_numbers = #tpu.dot_dimension_numbers<[1], [0], [0], [1], [0, 0, 1, 1], [], []>} : vector<128x384xbf16>, vector<384x128xbf16>, vector<128x128xf32> -> vector<128x128xf32>
    %58 = arith.addf %49, %57 : vector<128x128xf32>
    %59 = vector.extract_strided_slice %41 {offsets = [0, 0, 0], sizes = [8, 16, 128], strides = [1, 1, 1]} : vector<10x16x128xbf16> to vector<8x16x128xbf16>
    %60 = vector.extract_strided_slice %41 {offsets = [1, 0, 0], sizes = [8, 16, 128], strides = [1, 1, 1]} : vector<10x16x128xbf16> to vector<8x16x128xbf16>
    %61 = vector.extract_strided_slice %41 {offsets = [2, 0, 0], sizes = [8, 16, 128], strides = [1, 1, 1]} : vector<10x16x128xbf16> to vector<8x16x128xbf16>
    %62 = tpu.concatenate %59, %60, %61 in 2 : vector<8x16x128xbf16>, vector<8x16x128xbf16>, vector<8x16x128xbf16> -> vector<8x16x384xbf16>
    %63 = vector.shape_cast %62 : vector<8x16x384xbf16> to vector<128x384xbf16>
    %c2 = arith.constant 2 : index
    %c0_24 = arith.constant 0 : index
    %c0_25 = arith.constant 0 : index
    %64 = vector.load %arg7[%c2, %c0_24, %c0_25] : memref<3x384x128xbf16, #tpu.memory_space<vmem>>, vector<1x384x128xbf16>
    %65 = vector.shape_cast %64 : vector<1x384x128xbf16> to vector<384x128xbf16>
    %cst_26 = arith.constant dense<0.000000e+00> : vector<128x128xf32>
    %66 = tpu.matmul %63, %65, %cst_26 {dimension_numbers = #tpu.dot_dimension_numbers<[1], [0], [0], [1], [0, 0, 1, 1], [], []>} : vector<128x384xbf16>, vector<384x128xbf16>, vector<128x128xf32> -> vector<128x128xf32>
    %67 = arith.addf %58, %66 : vector<128x128xf32>
    %c0_27 = arith.constant 0 : index
    %c0_28 = arith.constant 0 : index
    %68 = vector.load %arg8[%c0_27, %c0_28] : memref<1x128xf32, #tpu.memory_space<vmem>>, vector<1x128xf32>
    %69 = vector.broadcast %68 : vector<1x128xf32> to vector<128x128xf32>
    %70 = arith.addf %67, %69 : vector<128x128xf32>
    %cst_29 = arith.constant 0.000000e+00 : f32
    %71 = vector.broadcast %cst_29 : f32 to vector<128x128xf32>
    %72 = arith.maximumf %70, %71 : vector<128x128xf32>
    %73 = arith.truncf %72 : vector<128x128xf32> to vector<128x128xbf16>
    %c0_30 = arith.constant 0 : index
    %c0_31 = arith.constant 0 : index
    %74 = vector.load %arg9[%c0_30, %c0_31] : memref<128x128xbf16, #tpu.memory_space<vmem>>, vector<128x128xbf16>
    %cst_32 = arith.constant dense<0.000000e+00> : vector<128x128xf32>
    %75 = tpu.matmul %73, %74, %cst_32 {dimension_numbers = #tpu.dot_dimension_numbers<[1], [0], [0], [1], [0, 0, 1, 1], [], []>} : vector<128x128xbf16>, vector<128x128xbf16>, vector<128x128xf32> -> vector<128x128xf32>
    %c0_33 = arith.constant 0 : index
    %c0_34 = arith.constant 0 : index
    %76 = vector.load %arg10[%c0_33, %c0_34] : memref<1x128xf32, #tpu.memory_space<vmem>>, vector<1x128xf32>
    %77 = vector.broadcast %76 : vector<1x128xf32> to vector<128x128xf32>
    %78 = arith.addf %75, %77 : vector<128x128xf32>
    %c0_35 = arith.constant 0 : index
    %c0_36 = arith.constant 0 : index
    %c0_37 = arith.constant 0 : index
    %79 = vector.load %arg3[%c0_35, %c0_36, %c0_37] : memref<1x128x128xf32, #tpu.memory_space<vmem>>, vector<1x128x128xf32>
    %80 = vector.shape_cast %79 : vector<1x128x128xf32> to vector<128x128xf32>
    %81 = arith.addf %78, %80 : vector<128x128xf32>
    %cst_38 = arith.constant 0.000000e+00 : f32
    %82 = vector.broadcast %cst_38 : f32 to vector<128x128xf32>
    %83 = arith.maximumf %81, %82 : vector<128x128xf32>
    %c0_39 = arith.constant 0 : index
    %c0_40 = arith.constant 0 : index
    %c0_41 = arith.constant 0 : index
    %84 = vector.load %arg11[%c0_39, %c0_40, %c0_41] : memref<1x128x128xf32, #tpu.memory_space<vmem>>, vector<1x128x128xf32>
    %85 = vector.shape_cast %84 : vector<1x128x128xf32> to vector<128x128xf32>
    %86 = vector.shape_cast %83 : vector<128x128xf32> to vector<1x128x128xf32>
    tpu.vector_store %arg11[%c0_39, %c0_40, %c0_41], %86 {strides = array<i32>} : memref<1x128x128xf32, #tpu.memory_space<vmem>>, vector<1x128x128xf32>,
    return
  }
  func.func @transform_0(%arg0: i32, %arg1: i32) -> (i32, i32, i32) {
    %c8_i32 = arith.constant 8 : i32
    %0 = arith.muli %arg1, %c8_i32 : i32
    %c1_i32 = arith.constant 1 : i32
    %1 = arith.subi %0, %c1_i32 : i32
    %c0_i32 = arith.constant 0 : i32
    %2 = arith.maxsi %1, %c0_i32 : i32
    %c0_i32_0 = arith.constant 0 : i32
    %c0_i32_1 = arith.constant 0 : i32
    return %arg0, %2, %c0_i32_0 : i32, i32, i32
  }
  func.func @transform_1(%arg0: i32, %arg1: i32) -> (i32, i32, i32) {
    %c0_i32 = arith.constant 0 : i32
    %c0_i32_0 = arith.constant 0 : i32
    return %arg0, %arg1, %c0_i32 : i32, i32, i32
  }
  func.func @transform_2(%arg0: i32, %arg1: i32) -> (i32, i32, i32) {
    %c1_i32 = arith.constant 1 : i32
    %0 = arith.addi %arg1, %c1_i32 : i32
    %c8_i32 = arith.constant 8 : i32
    %1 = arith.muli %0, %c8_i32 : i32
    %c15_i32 = arith.constant 15 : i32
    %2 = arith.minsi %1, %c15_i32 : i32
    %c0_i32 = arith.constant 0 : i32
    %c0_i32_0 = arith.constant 0 : i32
    return %arg0, %2, %c0_i32 : i32, i32, i32
  }
  func.func @transform_3(%arg0: i32, %arg1: i32) -> (i32, i32) {
    %c0_i32 = arith.constant 0 : i32
    %c0_i32_0 = arith.constant 0 : i32
    %c0_i32_1 = arith.constant 0 : i32
    return %c0_i32, %c0_i32_0 : i32, i32
  }
  func.func @transform_4(%arg0: i32, %arg1: i32) -> (i32, i32) {
    %c0_i32 = arith.constant 0 : i32
    %c0_i32_0 = arith.constant 0 : i32
    %c0_i32_1 = arith.constant 0 : i32
    return %c0_i32, %c0_i32_0 : i32, i32
  }
  func.func @transform_5(%arg0: i32, %arg1: i32) -> (i32, i32, i32) {
    %c0_i32 = arith.constant 0 : i32
    %c0_i32_0 = arith.constant 0 : i32
    %c0_i32_1 = arith.constant 0 : i32
    %c0_i32_2 = arith.constant 0 : i32
    return %c0_i32, %c0_i32_0, %c0_i32_1 : i32, i32, i32
  }
  func.func @transform_6(%arg0: i32, %arg1: i32) -> (i32, i32) {
    %c0_i32 = arith.constant 0 : i32
    %c0_i32_0 = arith.constant 0 : i32
    %c0_i32_1 = arith.constant 0 : i32
    return %c0_i32, %c0_i32_0 : i32, i32
  }
  func.func @transform_7(%arg0: i32, %arg1: i32) -> (i32, i32) {
    %c0_i32 = arith.constant 0 : i32
    %c0_i32_0 = arith.constant 0 : i32
    %c0_i32_1 = arith.constant 0 : i32
    return %c0_i32, %c0_i32_0 : i32, i32
  }
  func.func @transform_8(%arg0: i32, %arg1: i32) -> (i32, i32) {
    %c0_i32 = arith.constant 0 : i32
    %c0_i32_0 = arith.constant 0 : i32
    %c0_i32_1 = arith.constant 0 : i32
    return %c0_i32, %c0_i32_0 : i32, i32
  }
  func.func @transform_9(%arg0: i32, %arg1: i32) -> (i32, i32, i32) {
    %c0_i32 = arith.constant 0 : i32
    %c0_i32_0 = arith.constant 0 : i32
    return %arg0, %arg1, %c0_i32 : i32, i32, i32
  }
}

</mosaic_0001>

<bundles_post_ra>
// kernel: tpu_custom_call.1
= control target key start
LH: loop header
LB: loop body
LE: loop exit
PB: predicated region body
PF: predicated region fallthrough
CT: control target
= control target key end

     0   :  { %s5745_s0 = inlined_call_operand.hbm [shape: f32[2,256,128], index: 0, kind: input, shape index: {}]   ;;  %s5746_s1 = inlined_call_operand.hbm [shape: f32[2,256,128], index: 1, kind: input, shape index: {}]   ;;  %s5747_s2 = inlined_call_operand.hbm [shape: f32[2,256,128], index: 2, kind: input, shape index: {}]   ;;  %s5748_s3 = inlined_call_operand.hbm [shape: bf16[128,128], index: 3, kind: input, shape index: {}]   ;;  %s5749_s4 = inlined_call_operand.vmem [shape: f32[1,128], index: 4, kind: input, shape index: {}]   ;;  %s5750_s5 = inlined_call_operand.hbm [shape: bf16[3,384,128], index: 5, kind: input, shape index: {}]   ;;  %s5751_s6 = inlined_call_operand.vmem [shape: f32[1,128], index: 6, kind: input, shape index: {}]   ;;  %s5752_s7 = inlined_call_operand.hbm [shape: bf16[128,128], index: 7, kind: input, shape index: {}]   ;;  %s5753_s8 = inlined_call_operand.vmem [shape: f32[1,128], index: 8, kind: input, shape index: {}]   ;;  %s5754_s9 = inlined_call_operand.hbm [shape: f32[2,256,128], index: 9, kind: output, shape index: {}]  }
   0x1   :  { %5811 = sst [smem:[#allocation33_spill]] %s5745_s0 }
   0x2   :  { %5812 = sst [smem:[#allocation34_spill]] %s5746_s1 }
   0x3   :  { %5813 = sst [smem:[#allocation35_spill]] %s5747_s2 }
   0x4   :  { %5814 = sst [smem:[#allocation36_spill]] %s5748_s3 }
   0x5   :  { %5815 = sst [smem:[#allocation37_spill]] %s5749_s4 }
   0x6   :  { %5816 = sst [smem:[#allocation38_spill]] %s5750_s5 }
   0x7   :  { %5817 = sst [smem:[#allocation39_spill]] %s5751_s6 }
   0x8   :  { %5818 = sst [smem:[#allocation40_spill]] %s5752_s7 }
   0x9   :  { %5819 = sst [smem:[#allocation41_spill]] %s5753_s8 }
   0xa   :  { %5820 = sst [smem:[#allocation42_spill]] %s5754_s9 }
   0xb   :  { %14 = vsyncpa [#allocation3], 0 }
   0xc   :  { %16 = vsyncpa [#allocation3 + $0x1], 0 }
   0xd   :  { %17 = vsyncpa [#allocation6], 0 }
   0xe   :  { %19 = vsyncpa [#allocation6 + $0x1], 0 }
   0xf   :  { %20 = vsyncpa [#allocation9], 0 }
  0x10   :  { %21 = vsyncpa [#allocation12], 0 }
  0x11   :  { %22 = vsyncpa [#allocation4], 0 }
  0x12   :  { %24 = vsyncpa [#allocation4 + $0x1], 0  ;;  %s4214_s30 = smov 0   ;;  %s4216_s10 = smov 0  }
  0x13   :  { %s4218_s11 = smov 0   ;;  %s4220_s12 = smov 0  }
  0x14   :  { %s4222_s13 = smov 0   ;;  %s4224_s14 = smov 0  }
  0x15   :  { %s4226_s15 = smov 0   ;;  %s4228_s16 = smov 0  }
  0x16   :  { %s4230_s17 = smov 0   ;;  %s4232_s18 = smov 0  }
  0x17   :  { %s4234_s19 = smov 0   ;;  %s4236_s20 = smov 0  }
  0x18   :  { %s4238_s21 = smov 0   ;;  %s4240_s22 = smov 0  }
  0x19 LB: > { %5821 = sst [smem:[#allocation20_spill]] %s4096_s30  ;;  %s4285_s23 = sadd.s32 4294967295, %s4148_s22   ;;  %s4148_s22 = sphi %s4240_s22, %s30_s22   ;;  %s4144_s21 = sphi %s4238_s21, %s6007_s21   ;;  %s4140_s20 = sphi %s4236_s20, %s6006_s20   ;;  %s4136_s19 = sphi %s4234_s19, %s6005_s19   ;;  %s4132_s18 = sphi %s4232_s18, %s6004_s18   ;;  %s4128_s17 = sphi %s4230_s17, %s6003_s17   ;;  %s4124_s16 = sphi %s4228_s16, %s6002_s16   ;;  %s4120_s15 = sphi %s4226_s15, %s6001_s15   ;;  %s4116_s14 = sphi %s4224_s14, %s6000_s14   ;;  %s4112_s13 = sphi %s4222_s13, %s5999_s13   ;;  %s4108_s12 = sphi %s4220_s12, %s5995_s12   ;;  %s4104_s11 = sphi %s4218_s11, %s5998_s11   ;;  %s4100_s10 = sphi %s4216_s10, %s5994_s10   ;;  %s4096_s30 = sphi %s4214_s30, %s5993_s30  }
  0x1a   : > { %5822 = sst [smem:[#allocation21_spill]] %s4100_s10  ;;  %p2720_p0 = scmp.ge.s32.totalorder %s4148_s22, 1 }
  0x1b   : > { %5823 = sst [smem:[#allocation22_spill]] %s4104_s11  ;;  %p5772_p1 = scmp.eq.s32.totalorder %s4285_s23, 0 }
  0x1c   : > { %5824 = sst [smem:[#allocation23_spill]] %s4108_s12  ;;  %p288_p2 = scmp.eq.s32.totalorder %s4285_s23, 3 }
  0x1d   : > { %5825 = sst [smem:[#allocation24_spill]] %s4112_s13  ;;  %p301_p3 = scmp.lt.s32.totalorder %s4148_s22, 5 }
  0x1e   : > { %5826 = sst [smem:[#allocation25_spill]] %s4132_s18  ;;  %s4150_s25 = smov [#allocation8]  }
  0x1f   : > { %5827 = sst [smem:[#allocation26_spill]] %s4136_s19  ;;  %p4291_p4 = pnand %p2720_p0, %p301_p3 }
  0x20   : > { %s313_s26 = sshll.u32 %s4150_s25, 4  ;;  %s314_s26 = int_to_ptr.vmem [resolvable:$true] %s313_s26 }
  0x21   : > { %s5828_s24 = scalar_select %p4291_p4, 1, 0 }
  0x22   : > { %p3568_p5 = pneg %p4291_p4  ;;  %s3837_s28 = scalar_lea.vmem %s314_s26, 1024 }
  0x23   : > { %5829 = sst [smem:[#allocation27_spill]] %s5828_s24  ;;  %p3838_p8 = scmp.ne.s32.totalorder %s314_s26, %s3837_s28 }
  0x24   : > { %p4299_p6 = pnand %p3568_p5, %p5772_p1  ;;  %p3845_p11 = scmp.lt.s32.totalorder %s314_s26, %s314_s26 }
  0x25   : > { %p3846_p12 = scmp.lt.s32.totalorder %s3837_s28, %s3837_s28 }
  0x26   : > { %p5775_p7 = pneg %p4299_p6 }
  0x27   : > { %p3847_p13 = por %p3846_p12, %p3845_p11 }
  0x28   : > { %p3840_p9 = pnand %p3838_p8, %p5775_p7 }
  0x2a   : > { %p3841_p10 = pneg %p3840_p9 }
  0x2c   : > { %p3848_p0 = pnand %p3847_p13, %p3841_p10 }
  0x2e   : > { %3851 = shalt.err (!%p3848_p0)
}
  0x2f   : > { %s5757_s29 = smov 64   ;;  %s5759_s25 = smov 4  }
  0x30   : > { %s5831_s3 = sld [smem:[#allocation36_spill]]  ;;  %s2713_s19 = sadd.s32 4294967294, %s4148_s22  }
  0x31   : > { %s39_s8 = sadd.s32 1, %s4140_s20  ;;  %s42_s6 = sadd.s32 1, %s4144_s21 }
  0x32   : > { %p40_p3 = scmp.ge.s32.totalorder %s39_s8, 2  ;;  %p5773_p5 = scmp.eq.s32.totalorder %s4148_s22, 0 }
  0x33   : > { %p94_p8 = scmp.ne.s32.totalorder %s4116_s14, %s4112_s13  ;;  %p100_p9 = scmp.ne.s32.totalorder %s4112_s13, %s4108_s12 }
  0x34   : > { %s6009_s8 = smov (%p40_p3, %s39_s8), 0  ;;  %s6011_s6 = smov (!%p40_p3, %s42_s6), %s4144_s21 }
  0x35   : > { %5832 = sst [smem:[#allocation28_spill]] %s6009_s8  ;;  %p294_p10 = scmp.eq.s32.totalorder %s2713_s19, 3 }
  0x36   : > { %3571 = dma.hbm_to_vmem [thread:$0]  (!%p4299_p6), %s5831_s3, 1024, %s314_s26, [#allocation9], %s5757_s29, %s5757_s29, %s5759_s25  }
  0x37   : > { %p4334_p11 = por %p94_p8, %p5773_p5  ;;  %p4340_p12 = por %p288_p2, %p94_p8 }
  0x38   : > { %p4346_p13 = por %p100_p9, %p5772_p1  ;;  %p4350_p0 = por %p294_p10, %p100_p9 }
  0x39   : > { %s5834_s26 = scalar_select %p4340_p12, 1, 0 }
  0x3a   : > { %s5836_s28 = scalar_select %p4346_p13, 1, 0 }
  0x3b   : > { %5835 = sst [smem:[#allocation29_spill]] %s5834_s26  ;;  %p5774_p3 = scmp.lt.s32.totalorder %s4148_s22, 4 }
  0x3c   : > { %5837 = sst [smem:[#allocation30_spill]] %s5836_s28  ;;  %s4356_s19 = sshll.u32 %s4144_s21, 5 }
  0x3d   : > { %s5838_s4 = scalar_select %p4350_p0, 1, 0 }
  0x3e   : > { %s389_s18 = sand.u32 1, %s4148_s22   ;;  %s391_s29 = sand.u32 1, %s4116_s14  }
  0x3f   : > { %5839 = sst [smem:[#allocation31_spill]] %s5838_s4  ;;  %s2731_s25 = sshll.u32 %s391_s29, 7 }
  0x40   : > { %s2732_s3 = sshll.u32 %s4140_s20, 4  ;;  %s393_s13 = scalar_lea.vmem [#allocation5], %s2731_s25 }
  0x41   : > { %s399_s12 = sadd.s32 %s2732_s3, %s4356_s19  ;;  %s402_s26 = sshll.u32 %s393_s13, 4  ;;  %s403_s26 = int_to_ptr.vmem [resolvable:$true] %s402_s26 }
  0x42   : > { %s2734_s24 = sshll.u32 %s399_s12, 7  ;;  %s5840_s1 = sld [smem:[#allocation34_spill]] }
  0x43   : > { %p4369_p2 = pnand %p5774_p3, %p4334_p11  ;;  %s4153_s10 = smov [#allocation10]  }
  0x44   : > { %s329_s11 = sshll.u32 %s4153_s10, 4  ;;  %s4373_s29 = scalar_lea.sflag [#allocation6], %s389_s18  ;;  %s330_s11 = int_to_ptr.vmem [resolvable:$true] %s329_s11 }
  0x45   : > { %p3854_p8 = pneg %p4369_p2  ;;  %s3865_s3 = scalar_lea.vmem %s403_s26, 2048 }
  0x46   : > { %p3866_p9 = scmp.ne.s32.totalorder %s403_s26, %s3865_s3  ;;  %s4154_s12 = smov [#allocation5]  }
  0x47   : > { %s3870_s2 = sshll.u32 %s4154_s12, 4  ;;  %s3871_s2 = int_to_ptr.vmem [resolvable:$false] %s3870_s2 }
  0x48   : > { %s401_s28 = scalar_lea.hbm %s5840_s1, %s2734_s24  ;;  %p3868_p10 = pnand %p3866_p9, %p3854_p8 }
  0x49   : > { %s3872_s30 = scalar_lea.vmem %s3871_s2, 4096  ;;  %p3873_p5 = scmp.lt.s32.totalorder %s403_s26, %s3871_s2 }
  0x4a   : > { %p3869_p1 = pneg %p3868_p10  ;;  %p3874_p11 = scmp.lt.s32.totalorder %s3872_s30, %s3865_s3 }
  0x4c   : > { %p3875_p3 = por %p3874_p11, %p3873_p5 }
  0x4e   : > { %p3876_p7 = pnand %p3875_p3, %p3869_p1 }
  0x50   : > { %3879 = shalt.err (!%p3876_p7)
}
  0x51   : > { %s5776_s13 = smov 128   ;;  %s5778_s10 = smov 8  }
  0x52   : > { %3584 = dma.hbm_to_vmem [thread:$0]  (!%p4369_p2), %s401_s28, 2048, %s403_s26, %s4373_s29, %s5776_s13, %s5776_s13, %s5778_s10  }
  0x53   : > { %s4157_s18 = smov [#allocation11]   ;;  %s3891_s25 = scalar_lea.vmem %s330_s11, 9216 }
  0x54   : > { %s345_s24 = sshll.u32 %s4157_s18, 4  ;;  %p3892_p8 = scmp.ne.s32.totalorder %s330_s11, %s3891_s25  ;;  %s346_s24 = int_to_ptr.vmem [resolvable:$true] %s345_s24 }
  0x55   : > { %p5842_p9 = pneg %p4299_p6  ;;  %p3899_p7 = scmp.lt.s32.totalorder %s330_s11, %s330_s11 }
  0x56   : > { %p3900_p3 = scmp.lt.s32.totalorder %s3891_s25, %s3891_s25 }
  0x57   : > { %p3894_p5 = pnand %p3892_p8, %p5842_p9 }
  0x58   : > { %p3901_p10 = por %p3900_p3, %p3899_p7 }
  0x59   : > { %p3895_p1 = pneg %p3894_p5 }
  0x5b   : > { %p3902_p11 = pnand %p3901_p10, %p3895_p1 }
  0x5d   : > { %3905 = shalt.err (!%p3902_p11)
}
  0x5e   : > { %s5843_s4 = smov 4   ;;  %s5844_s9 = smov 64  }
  0x5f   : > { %s5845_s5 = sld [smem:[#allocation38_spill]]  ;;  %s3917_s3 = scalar_lea.vmem %s346_s24, 1024 }
  0x60   : > { %p3918_p2 = scmp.ne.s32.totalorder %s346_s24, %s3917_s3  ;;  %p5846_p8 = pmov %p5842_p9 }
  0x61   : > { %p3925_p7 = scmp.lt.s32.totalorder %s346_s24, %s346_s24  ;;  %p3926_p1 = scmp.lt.s32.totalorder %s3917_s3, %s3917_s3 }
  0x62   : > { %p3920_p9 = pnand %p3918_p2, %p5846_p8 }
  0x63   : > { %p3927_p3 = por %p3926_p1, %p3925_p7 }
  0x64   : > { %p3921_p5 = pneg %p3920_p9 }
  0x65   : > { %3574 = dma.hbm_to_vmem [thread:$0]  (!%p4299_p6), %s5845_s5, 9216, %s330_s11, [#allocation9], %s5844_s9, %s5844_s9, %s5843_s4  }
  0x66   : > { %p3928_p10 = pnand %p3927_p3, %p3921_p5 }
  0x68   : > { %3931 = shalt.err (!%p3928_p10)
}
  0x69   : > { %s5847_s7 = sld [smem:[#allocation40_spill]]  ;;  %p44_p11 = scmp.ge.s32.totalorder %s6011_s6, 2 }
  0x6a   : > { %s2714_s11 = sshll.u32 %s4140_s20, 3  ;;  %s2716_s27 = sshll.u32 %s6009_s8, 3 }
  0x6b   : > { %s6013_s6 = smov (%p44_p11, %s6011_s6), 0  ;;  %s2715_s30 = sadd.s32 4294967295, %s2714_s11 }
  0x6c   : > { %5848 = sst [smem:[#allocation32_spill]] %s6013_s6  ;;  %s2717_s18 = sadd.s32 4294967295, %s2716_s27 }
  0x6d   : > { %p48_p2 = scmp.gt.s32.totalorder %s2715_s30, 0  ;;  %p52_p8 = scmp.gt.s32.totalorder %s2717_s18, 0 }
  0x6e   : > { %s4413_s25 = ssub.s32 %s4144_s21, %s6013_s6  ;;  %p72_p9 = scmp.ne.s32.totalorder %s4124_s16, %s4120_s15 }
  0x6f   : > { %3577 = dma.hbm_to_vmem [thread:$0]  (!%p4299_p6), %s5847_s7, 1024, %s346_s24, [#allocation12], %s5844_s9, %s5844_s9, %s5843_s4  }
  0x70   : > { %s59_s24 = sadd.s32 1, %s4128_s17  ;;  %s6015_s30 = smov (!%p48_p2, %s2715_s30), 0 }
  0x71   : > { %s6017_s18 = smov (!%p52_p8, %s2717_s18), 0  ;;  %p66_p6 = scmp.ne.s32.totalorder %s4128_s17, %s4124_s16 }
  0x72   : > { %s55_s4 = ssub.s32 %s6015_s30, %s6017_s18  ;;  %s5849_s9 = ssub.s32 %s4140_s20, %s6009_s8 }
  0x73   : > { %s84_s26 = sor.u32 %s5849_s9, %s4413_s25  ;;  %s56_s28 = sor.u32 %s55_s4, %s4413_s25 }
  0x74   : > { %p5850_p5 = scmp.eq.s32.totalorder %s4148_s22, 0  ;;  %p57_p1 = scmp.eq.s32.totalorder %s56_s28, 0 }
  0x75   : > { %p5852_p3 = scmp.eq.s32.totalorder %s4285_s23, 0  ;;  %p85_p11 = scmp.eq.s32.totalorder %s84_s26, 0 }
  0x76   : > { %p4427_p7 = por %p5850_p5, %p66_p6  ;;  %s4437_s15 = sadd.s32 8, %s2714_s11 }
  0x77   : > { %p4433_p10 = por %p5852_p3, %p72_p9  ;;  %s5854_s18 = sadd.s32 1, %s4116_s14 }
  0x78   : > { %s4440_s2 = scalar_select %p57_p1, %s4128_s17, %s59_s24  }
  0x79   : > { %s4445_s4 = scalar_select %p85_p11, %s4116_s14, %s5854_s18  }
  0x7a   : > { %s4448_s9 = sadd.s32 8, %s2716_s27  ;;  %s362_s28 = sand.u32 1, %s4128_s17  }
  0x7b   : > { %s2725_s13 = sshll.u32 %s362_s28, 4  ;;  %s2728_s10 = sshll.u32 %s6015_s30, 1 }
  0x7c   : > { %s376_s1 = sadd.s32 %s4356_s19, %s2728_s10  ;;  %s366_s26 = scalar_lea.vmem [#allocation2], %s2725_s13 }
  0x7d   : > { %s379_s5 = sshll.u32 %s366_s26, 4  ;;  %s2730_s7 = sshll.u32 %s376_s1, 7  ;;  %s380_s5 = int_to_ptr.vmem [resolvable:$true] %s379_s5 }
  0x7e   : > { %s5855_s0 = sld [smem:[#allocation33_spill]]  ;;  %p5856_p6 = scmp.lt.s32.totalorder %s4148_s22, 4 }
  0x7f   : > { %s363_s27 = scalar_lea.sflag [#allocation3], %s362_s28  ;;  %s3945_s30 = scalar_lea.vmem %s380_s5, 256 }
  0x80   : > { %p4460_p9 = pnand %p5856_p6, %p4427_p7  ;;  %p3946_p1 = scmp.ne.s32.totalorder %s380_s5, %s3945_s30 }
  0x81   : > { %s4158_s1 = smov [#allocation2]  }
  0x82   : > { %p3934_p5 = pneg %p4460_p9  ;;  %s3950_s13 = sshll.u32 %s4158_s1, 4  ;;  %s3951_s13 = int_to_ptr.vmem [resolvable:$false] %s3950_s13 }
  0x83   : > { %s3952_s10 = scalar_lea.vmem %s3951_s13, 512  ;;  %p3953_p8 = scmp.lt.s32.totalorder %s380_s5, %s3951_s13 }
  0x84   : > { %s378_s24 = scalar_lea.hbm %s5855_s0, %s2730_s7  ;;  %p3948_p3 = pnand %p3946_p1, %p3934_p5 }
  0x85   : > { %p3954_p2 = scmp.lt.s32.totalorder %s3952_s10, %s3945_s30 }
  0x86   : > { %p3949_p11 = pneg %p3948_p3 }
  0x87   : > { %p3955_p0 = por %p3954_p2, %p3953_p8 }
  0x89   : > { %p3956_p12 = pnand %p3955_p0, %p3949_p11 }
  0x8b   : > { %3959 = shalt.err (!%p3956_p12)
}
  0x8c   : > { %s5858_s6 = smov 8   ;;  %s5859_s7 = smov 128  }
  0x8d   : > { %s5860_s3 = sld [smem:[#allocation22_spill]]  ;;  %p5863_p12 = scmp.lt.s32.totalorder %s4437_s15, 15 }
  0x8e   : > { %s5861_s28 = sld [smem:[#allocation21_spill]]  ;;  %p5864_p0 = scmp.lt.s32.totalorder %s4448_s9, 15 }
  0x8f   : > { %s5862_s26 = sld [smem:[#allocation20_spill]]  ;;  %s6019_s15 = smov (!%p5863_p12, %s4437_s15), 15 }
  0x90   : > { %3581 = dma.hbm_to_vmem [thread:$0]  (!%p4460_p9), %s378_s24, 256, %s380_s5, %s363_s27, %s5859_s7, %s5859_s7, %s5858_s6  }
  0x91   : > { %s6021_s9 = smov (!%p5864_p0, %s4448_s9), 15  ;;  %p5865_p8 = scmp.eq.s32.totalorder %s4148_s22, 0 }
  0x92   : > { %s119_s18 = ssub.s32 %s6019_s15, %s6021_s9  ;;  %p5866_p1 = scmp.eq.s32.totalorder %s4285_s23, 0 }
  0x93   : > { %s123_s11 = sadd.s32 1, %s5860_s3  ;;  %s414_s30 = sand.u32 1, %s5860_s3  }
  0x94   : > { %p130_p7 = scmp.ne.s32.totalorder %s5860_s3, %s5861_s28  ;;  %s120_s1 = sor.u32 %s119_s18, %s4413_s25 }
  0x95   : > { %p136_p2 = scmp.ne.s32.totalorder %s5861_s28, %s5862_s26  ;;  %p121_p5 = scmp.eq.s32.totalorder %s120_s1, 0 }
  0x96   : > { %p132_p6 = por %p130_p7, %p5865_p8  ;;  %s2735_s5 = sshll.u32 %s414_s30, 4 }
  0x97   : > { %p4488_p3 = por %p136_p2, %p5866_p1  ;;  %s2737_s24 = sshll.u32 %s6019_s15, 1 }
  0x98   : > { %s6023_s3 = smov (!%p121_p5, %s5860_s3), %s123_s11  ;;  %s426_s27 = sadd.s32 %s2737_s24, %s4356_s19 }
  0x99   : > { %s5867_s13 = scalar_select %p4488_p3, 1, 0 }
  0x9a   : > { %s2739_s10 = sshll.u32 %s426_s27, 7  ;;  %s416_s0 = scalar_lea.vmem [#allocation7], %s2735_s5 }
  0x9b   : > { %s429_s28 = sshll.u32 %s416_s0, 4  ;;  %s5868_s8 = sld [smem:[#allocation35_spill]]  ;;  %s430_s28 = int_to_ptr.vmem [resolvable:$true] %s429_s28 }
  0x9c   : > { %p5869_p9 = scmp.lt.s32.totalorder %s4148_s22, 4  ;;  %s3973_s15 = scalar_lea.vmem %s430_s28, 256 }
  0x9d   : > { %p3974_p0 = scmp.ne.s32.totalorder %s430_s28, %s3973_s15  ;;  %s4159_s19 = smov [#allocation7]  }
  0x9e   : > { %p4501_p11 = pnand %p5869_p9, %p132_p6  ;;  %s3978_s11 = sshll.u32 %s4159_s19, 4  ;;  %s3979_s11 = int_to_ptr.vmem [resolvable:$false] %s3978_s11 }
  0x9f   : > { %s3980_s0 = scalar_lea.vmem %s3979_s11, 512  ;;  %p3981_p8 = scmp.lt.s32.totalorder %s430_s28, %s3979_s11 }
  0xa0   : > { %p3962_p12 = pneg %p4501_p11  ;;  %p3982_p5 = scmp.lt.s32.totalorder %s3980_s0, %s3973_s15 }
  0xa1   : > { %s428_s25 = scalar_lea.hbm %s5868_s8, %s2739_s10 }
  0xa2   : > { %p3976_p7 = pnand %p3974_p0, %p3962_p12  ;;  %p3983_p1 = por %p3982_p5, %p3981_p8 }
  0xa4   : > { %p3977_p2 = pneg %p3976_p7 }
  0xa6   : > { %p3984_p3 = pnand %p3983_p1, %p3977_p2 }
  0xa8   : > { %3987 = shalt.err (!%p3984_p3)
}
  0xa9   : > { %3587 = dma.hbm_to_vmem [thread:$0]  (!%p4501_p11), %s428_s25, 256, %s430_s28, %s4373_s29, %s5859_s7, %s5859_s7, %s5858_s6  }
  0xaa   : > { %441 = sbr.rel (%p4291_p4) target bundleno = 1023 (0x3ff), region = 56  ;;  %s443_s30 = sand.u32 (!%p4291_p4), 1, %s4124_s16  }
  0xab   : > { %s4516_s1 = sshll.u32 (!%p4291_p4), %s443_s30, 4  ;;  %s444_s5 = scalar_lea.sflag (!%p4291_p4), [#allocation3], %s443_s30 }
  0xac   : > { %s447_s24 = scalar_lea.vmem (!%p4291_p4), [#allocation2], %s4516_s1 }
  0xaf   : > { %4071 = dma.done.wait (%p4433_p10), %s444_s5, 256  }
  0xb0   : > { %4073 = vsyncadd (%p4433_p10), %s444_s5, 4294967040  ;;  %s5872_s27 = sld [smem:[#allocation24_spill]]  ;;  %s452_s6 = sand.u32 1, %s4285_s23  }
  0xb1   : > { %s453_s28 = scalar_lea.sflag [#allocation6], %s452_s6 }
  0xb6   : > { %s454_s7 = sand.u32 1, %s5872_s27  }
  0xb7   : > { %s4527_s10 = sshll.u32 %s454_s7, 7 }
  0xb8   : > { %s4530_s26 = scalar_lea.vmem [#allocation5], %s4527_s10 }
  0xb9   : > { %4075 = dma.done.wait (%p4346_p13), %s453_s28, 2048  }
  0xba   : > { %4077 = vsyncadd (%p4346_p13), %s453_s28, 4294965248  ;;  %s5874_s12 = sld [smem:[#allocation21_spill]]  ;;  %p5875_p4 = scmp.ne.s32.totalorder %s5867_s13, 0 }
  0xc0   : > { %s463_s9 = sand.u32 1, %s5874_s12  }
  0xc1   : > { %s4537_s25 = sshll.u32 %s463_s9, 4 }
  0xc2   : > { %s465_s18 = scalar_lea.vmem [#allocation7], %s4537_s25 }
  0xc3   : > { %4079 = dma.done.wait (%p5875_p4), %s453_s28, 256  }
  0xc4   : > { %4081 = vsyncadd (%p5875_p4), %s453_s28, 4294967040  ;;  %p5876_p10 = scmp.eq.s32.totalorder %s4285_s23, 0 }
  0xc6   : > { %4083 = dma.done.wait (%p5876_p10), [#allocation9], 10240   ;;  %p5877_p6 = pmov %p5876_p10 }
  0xc8   : > { %4085 = vsyncadd (%p5877_p6), [#allocation9], 4294957056  ;;  %p5878_p13 = pmov %p5877_p6 }
  0xc9   : > { %p5879_p3 = pmov %p5877_p6 }
  0xca   : > { %4087 = dma.done.wait (%p5878_p13), [#allocation12], 1024  }
  0xcb   : > { %4089 = vsyncadd (%p5879_p3), [#allocation12], 4294966272  ;;  %v3722_v0 = vld [vmem:[#allocation8 + $0x38] sm:$0xff]   ;;  %v3723_v1 = vld [vmem:[#allocation8 + $0x30] sm:$0xff]   ;;  %s5880_s23 = sld [smem:[#allocation25_spill]]  ;;  %s5613_s9 = scalar_lea.vmem [#allocation13], %s4527_s10 }
  0xcc   : > { %3368 = vmatprep.subr.bf16.mxu0 %v3722_v0  ;;  %v3724_v2 = vld [vmem:[#allocation8 + $0x28] sm:$0xff]   ;;  %v3725_v3 = vld [vmem:[#allocation8 + $0x20] sm:$0xff]   ;;  %v3726_v7 = vld [vmem:[#allocation8 + $0x18] sm:$0xff]   ;;  %s5881_s1 = sld [smem:[#allocation37_spill]] }
  0xcd   : > { %3369 = vmatpush3.bf16.msra.mxu0 %v3722_v0  ;;  %v535_v4 = vld [vmem:[%s447_s24] sm:$0xff]  ;;  %v536_v5 = vld [vmem:[%s447_s24 + $0x8] sm:$0xff]  ;;  %v769_v0 = vlaneseq  ;;  %s5983_s29 = sld [smem:[#allocation39_spill]] }
  0xce   : > { %3370 = vmatprep.subr.bf16.mxu0 %v3723_v1  ;;  %v537_v6 = vpack.c.bf16 %v536_v5, %v535_v4  ;;  %v3727_v8 = vld [vmem:[#allocation8 + $0x10] sm:$0xff]   ;;  %v3730_v9 = vld [vmem:[#allocation10 + $0x138] sm:$0xff]   ;;  %v3734_v13 = vld [vmem:[#allocation10 + $0x128] sm:$0xff]   ;;  %s5984_s12 = sld [smem:[#allocation41_spill]] }
  0xcf   : > { %v3731_v10 = vld [vmem:[#allocation10 + $0xf8] sm:$0xff]   ;;  %3112 = vmatprep.subr.bf16.mxu1 %v3730_v9  ;;  %v3732_v11 = vld [vmem:[#allocation10 + $0x130] sm:$0xff]   ;;  %v3728_v14 = vld [vmem:[#allocation8 + $0x8] sm:$0xff]   ;;  %s5985_s10 = sld [smem:[#allocation26_spill]] }
  0xd0   : > { %3384 = vmatprep.mubr.bf16.mxu0 %v537_v6  ;;  %3113 = vmatpush3.bf16.msra.mxu1 %v3731_v10  ;;  %v3733_v12 = vld [vmem:[#allocation10 + $0xf0] sm:$0xff]   ;;  %v3735_v15 = vld [vmem:[#allocation10 + $0xe8] sm:$0xff]   ;;  %v3737_v16 = vld [vmem:[#allocation10 + $0x120] sm:$0xff]   ;;  %s5987_s8 = sld [smem:[#allocation42_spill]] }
  0xd1   : > { %3371 = vmatpush3.bf16.msra.mxu0 %v3723_v1  ;;  %3114 = vmatprep.subr.bf16.mxu1 %v3732_v11  ;;  %v3729_v17 = vld [vmem:[#allocation8] sm:$0xff]   ;;  %v539_v19 = vld [vmem:[%s4530_s26 + $0x8] sm:$0xff]  ;;  %v540_v20 = vld [vmem:[%s4530_s26 + $0x10] sm:$0xff]  ;;  %s2757_s13 = sshll.u32 %s5880_s23, 3  ;;  %v4576_v1 = vshrl.u32 %v769_v0, 7  ;;  %s3083_s25 = sshll.u32 %s5880_s23, 4 }
  0xd2   : > { %3372 = vmatprep.subr.bf16.mxu0 %v3724_v2  ;;  %v538_v18 = vld [vmem:[%s4530_s26] sm:$0xff]  ;;  %v541_v21 = vld [vmem:[%s4530_s26 + $0x18] sm:$0xff]  ;;  %v3739_v27 = vld [vmem:[#allocation10 + $0x170] sm:$0xff]   ;;  %s791_s15 = ssub.s32 1, %s2757_s13  ;;  %s793_s19 = ssub.s32 17, %s2757_s13 }
  0xd3   : > { %v3736_v22 = vld [vmem:[#allocation10 + $0x178] sm:$0xff]   ;;  %v3738_v23 = vld [vmem:[#allocation10 + $0xe0] sm:$0xff]   ;;  %v554_v26 = vpack.c.bf16 %v539_v19, %v538_v18  ;;  %v555_v28 = vpack.c.bf16 %v541_v21, %v540_v20  ;;  %v543_v30 = vld [vmem:[%s4530_s26 + $0x28] sm:$0xff]  ;;  %s2758_s11 = sshll.u32 %s791_s15, 4  ;;  %s2759_s0 = sshll.u32 %s793_s19, 4  ;;  %v5886_v20 = vmov 0 }
  0xd4   : > { %3115 = vmatpush3.bf16.msra.mxu1 %v3733_v12  ;;  %v3740_v24 = vld [vmem:[#allocation10 + $0x118] sm:$0xff]   ;;  %v542_v29 = vld [vmem:[%s4530_s26 + $0x20] sm:$0xff]  ;;  %v544_v31 = vld [vmem:[%s4530_s26 + $0x30] sm:$0xff]  ;;  %v4585_v6 = vstv %s2758_s11  ;;  %s5986_s13 = sld [smem:[#allocation29_spill]]  ;;  %s2544_s15 = sshll.u32 %s5613_s9, 4  ;;  %s5659_s15 = int_to_ptr.vmem [resolvable:$true] %s2544_s15 }
  0xd5   : > { %3373 = vmatpush3.bf16.msra.mxu0 %v3724_v2  ;;  %3116 = vmatprep.subr.bf16.mxu1 %v3734_v13  ;;  %v3741_v25 = vld [vmem:[#allocation10 + $0xd8] sm:$0xff]   ;;  %v3742_v33 = vld [vmem:[#allocation10 + $0x168] sm:$0xff]   ;;  %v556_v34 = vpack.c.bf16 %v543_v30, %v542_v29  ;;  %v546_v36 = vld [vmem:[%s4530_s26 + $0x40] sm:$0xff]  ;;  %v773_v2 = vadd.s32 24, %v4576_v1  ;;  %vm796_vm7 = vcmp.ge.s32.totalorder %v4576_v1, %v4585_v6  ;;  %v774_v29 = vadd.s32 32, %v4576_v1  ;;  %s3988_s5 = scalar_lea.vmem %s5659_s15, 2048 }
  0xd6   : > { %3374 = vmatprep.subr.bf16.mxu0 %v3725_v3  ;;  %v545_v32 = vld [vmem:[%s4530_s26 + $0x38] sm:$0xff]  ;;  %v547_v37 = vld [vmem:[%s4530_s26 + $0x48] sm:$0xff]  ;;  %v548_v38 = vld [vmem:[%s4530_s26 + $0x50] sm:$0xff]  ;;  %p3989_p9 = scmp.ne.s32.totalorder %s5659_s15, %s3988_s5 }
  0xd7   : > { %v557_v35 = vpack.c.bf16 %v545_v32, %v544_v31  ;;  %v549_v39 = vld [vmem:[%s4530_s26 + $0x58] sm:$0xff]  ;;  %v558_v40 = vpack.c.bf16 %v547_v37, %v546_v36  ;;  %v550_v42 = vld [vmem:[%s4530_s26 + $0x60] sm:$0xff]  ;;  %v551_v43 = vld [vmem:[%s4530_s26 + $0x68] sm:$0xff]  ;;  %vm799_vm0 = vcmp.ge.s32.totalorder %v773_v2, %v4585_v6  ;;  %v777_v32 = vadd.s32 56, %v4576_v1 }
  0xd8   : > { %3117 = vmatpush3.bf16.msra.mxu1 %v3735_v15  ;;  %v559_v41 = vpack.c.bf16 %v549_v39, %v548_v38  ;;  %v552_v44 = vld [vmem:[%s4530_s26 + $0x70] sm:$0xff]  ;;  %v553_v45 = vld [vmem:[%s4530_s26 + $0x78] sm:$0xff]  ;;  %v560_v46 = vpack.c.bf16 %v551_v43, %v550_v42  ;;  %v3745_v53 = vld [vmem:[#allocation10 + $0x160] sm:$0xff]   ;;  %v5890_v39 = vmov 0 }
  0xd9   : > { %3375 = vmatpush3.bf16.msra.mxu0 %v3725_v3  ;;  %3118 = vmatprep.subr.bf16.mxu1 %v3737_v16  ;;  %v561_v47 = vpack.c.bf16 %v553_v45, %v552_v44  ;;  %v562_v48 = vld [vmem:[%s465_s18] sm:$0xff]  ;;  %v563_v49 = vld [vmem:[%s465_s18 + $0x8] sm:$0xff]  ;;  %v772_v3 = vadd.s32 16, %v4576_v1  ;;  %v5884_v16 = vmov 0  ;;  %v780_v45 = vadd.s32 80, %v4576_v1  ;;  %s3084_s18 = sshll.u32 %s5985_s10, 5 }
  0xda   : > { %3376 = vmatprep.subr.bf16.mxu0 %v3726_v7  ;;  %v564_v50 = vpack.c.bf16 %v563_v49, %v562_v48  ;;  %v3743_v51 = vld [vmem:[#allocation10 + $0x110] sm:$0xff]   ;;  %v3746_v54 = vld [vmem:[#allocation10 + $0x108] sm:$0xff]   ;;  %v3748_v56 = vld [vmem:[#allocation10 + $0x158] sm:$0xff]   ;;  %v778_v48 = vadd.s32 64, %v4576_v1  ;;  %s2541_s23 = sadd.s32 %s3084_s18, %s3083_s25  ;;  %p5988_p11 = scmp.ne.s32.totalorder %s5986_s13, 0 }
  0xdb   : > { %v3744_v52 = vld [vmem:[#allocation10 + $0xd0] sm:$0xff]   ;;  %v3747_v55 = vld [vmem:[#allocation10 + $0xc8] sm:$0xff]   ;;  %v3749_v57 = vld [vmem:[#allocation10 + $0x100] sm:$0xff]   ;;  %vm798_vm2 = vcmp.ge.s32.totalorder %v772_v3, %v4585_v6  ;;  %s3085_s19 = sshll.u32 %s2541_s23, 7 }
  0xdc   : > { %3119 = vmatpush3.bf16.msra.mxu1 %v3738_v23  ;;  %v3750_v58 = vld [vmem:[#allocation10 + $0xc0] sm:$0xff]   ;;  %v3751_v59 = vld [vmem:[#allocation10 + $0x150] sm:$0xff]   ;;  %v3753_v60 = vld [vmem:[#allocation10 + $0x148] sm:$0xff]   ;;  %s5665_s30 = scalar_lea.hbm %s5987_s8, %s3085_s19  ;;  %p3990_p12 = pnand %p3989_p9, %p5988_p11 }
  0xdd   : > { %3377 = vmatpush3.bf16.msra.mxu0 %v3726_v7  ;;  %3120 = vmatprep.subr.bf16.mxu1 %v3740_v24  ;;  %v3755_v61 = vld [vmem:[#allocation10 + $0x140] sm:$0xff]   ;;  %v4572_v62 = vld [vmem:[#allocation10 + $0xb8] sm:$0xff]   ;;  %v4587_v7 = vstv %s2759_s0  ;;  %v5888_v24 = vmov 0  ;;  %v3757_v37 = vld [vmem:[#allocation10 + $0x30] sm:$0xff]  }
  0xde   : > { %3378 = vmatprep.subr.bf16.mxu0 %v3727_v8  ;;  %v3752_v63 = vld [vmem:[#allocation10 + $0x78] sm:$0xff]   ;;  %v4583_v5 = vld [vmem:[%s5881_s1] ss:$0 sm:$0xff]  ;;  %vm820_vm1 = vcmp.lt.s32.totalorder %v773_v2, %v4587_v7  ;;  %vm819_vm3 = vcmp.lt.s32.totalorder %v772_v3, %v4587_v7  ;;  %vm817_vm8 = vcmp.lt.s32.totalorder %v4576_v1, %v4587_v7  ;;  %v3759_v0 = vld [vmem:[#allocation10 + $0xb0] sm:$0xff]   ;;  %s5670_s1 = scalar_lea.sflag [#allocation4], %s454_s7  ;;  %p3991_p0 = pneg %p3990_p12 }
  0xdf   : > { %vm4605_vm6 = vmand %vm799_vm0, %vm820_vm1  ;;  %v3754_v30 = vld [vmem:[#allocation10 + $0x38] sm:$0xff]   ;;  %v3761_v2 = vld [vmem:[#allocation10 + $0x28] sm:$0xff]  }
  0xe0   : > { %3121 = vmatpush3.bf16.msra.mxu1 %v3741_v25  ;;  %vm4613_vm9 = vmand %vm798_vm2, %vm819_vm3  ;;  %vm800_vm2 = vcmp.ge.s32.totalorder %v774_v29, %v4585_v6  ;;  %vm821_vm3 = vcmp.lt.s32.totalorder %v774_v29, %v4587_v7  ;;  %v783_v29 = vadd.s32 104, %v4576_v1 }
  0xe1   : > { %3379 = vmatpush3.bf16.msra.mxu0 %v3727_v8  ;;  %3122 = vmatprep.subr.bf16.mxu1 %v3743_v51  ;;  %v771_v8 = vadd.s32 8, %v4576_v1  ;;  %v5885_v16 = vsel %vm4613_vm9, 4294967295, %v5884_v16  ;;  %vm5784_vm11 = vmpackc.low %vm4605_vm6, %vm4613_vm9 }
  0xe2   : > { %3380 = vmatprep.subr.bf16.mxu0 %v3728_v14  ;;  %vm4632_vm12 = vmand %vm796_vm7, %vm817_vm8  ;;  %vm824_vm7 = vcmp.lt.s32.totalorder %v777_v32, %v4587_v7 }
  0xe3   : > { %vm797_vm4 = vcmp.ge.s32.totalorder %v771_v8, %v4585_v6  ;;  %vm818_vm5 = vcmp.lt.s32.totalorder %v771_v8, %v4587_v7  ;;  %v5889_v24 = vsel %vm4632_vm12, 4294967295, %v5888_v24  ;;  %v5902_v8 = vmov 0 }
  0xe4   : > { %3123 = vmatpush3.bf16.msra.mxu1 %v3744_v52  ;;  %vm4622_vm10 = vmand %vm797_vm4, %vm818_vm5  ;;  %vm803_vm5 = vcmp.ge.s32.totalorder %v777_v32, %v4585_v6  ;;  %v5912_v32 = vmov 0 }
  0xe5   : > { %3381 = vmatpush3.bf16.msra.mxu0 %v3728_v14  ;;  %3124 = vmatprep.subr.bf16.mxu1 %v3746_v54  ;;  %v5882_v14 = vmov 0  ;;  %v5887_v20 = vsel %vm4622_vm10, 4294967295, %v5886_v20  ;;  %vm2787_vm13 = vmpackc.low %vm4622_vm10, %vm4632_vm12 }
  0xe6   : > { %3382 = vmatprep.subr.bf16.mxu0 %v3729_v17  ;;  %v5883_v14 = vsel %vm4605_vm6, 4294967295, %v5882_v14  ;;  %vm5904_vm10 = vmpackc.low %vm4605_vm6, %vm4613_vm9 }
  0xe8   : > { %3125 = vmatpush3.bf16.msra.mxu1 %v3747_v55  ;;  %v781_v55 = vadd.s32 88, %v4576_v1 }
  0xe9   : > { %3383 = vmatpush3.bf16.msra.mxu0 %v3729_v17  ;;  %3126 = vmatprep.subr.bf16.mxu1 %v3749_v57 }
  0xea   : > { %3404 = vmatprep.subr.bf16.mxu0 %v3736_v22  ;;  %vm828_vm12 = vcmp.lt.s32.totalorder %v781_v55, %v4587_v7 }
  0xec   : > { %3385 = vmatmul.mubr.bf16.vlgmr.msra.gmra.mxu0 %v554_v26  ;;  %3127 = vmatpush3.bf16.msra.mxu1 %v3750_v58 }
  0xed   : > { %3388 = vmatprep.mubr.bf16.mxu0 %v555_v28  ;;  %3405 = vmatpush3.bf16.msra.mxu0 %v3736_v22  ;;  %v776_v22 = vadd.s32 48, %v4576_v1 }
  0xee   : > { %3406 = vmatprep.subr.bf16.mxu0 %v3739_v27  ;;  %3192 = vmatprep.subr.bf16.mxu1 %v3752_v63 }
  0xef   : > { %vm802_vm14 = vcmp.ge.s32.totalorder %v776_v22, %v4585_v6  ;;  %vm823_vm15 = vcmp.lt.s32.totalorder %v776_v22, %v4587_v7 }
  0xf0   : > { %vm4672_vm4 = vmand %vm802_vm14, %vm823_vm15 }
  0xf1   : > { %3407 = vmatpush3.bf16.msra.mxu0 %v3739_v27  ;;  %v775_v27 = vadd.s32 40, %v4576_v1  ;;  %v5891_v39 = vsel %vm4672_vm4, 4294967295, %v5890_v39  ;;  %vm4704_vm14 = vmand %vm803_vm5, %vm824_vm7 }
  0xf2   : > { %3408 = vmatprep.subr.bf16.mxu0 %v3742_v33 }
  0xf3   : > { %vm801_vm0 = vcmp.ge.s32.totalorder %v775_v27, %v4585_v6  ;;  %vm822_vm1 = vcmp.lt.s32.totalorder %v775_v27, %v4587_v7 }
  0xf4   : > { %3389 = vmatmul.mubr.bf16.gmra.mxu0 %v556_v34  ;;  %vm4688_vm8 = vmand %vm801_vm0, %vm822_vm1  ;;  %vm806_vm1 = vcmp.ge.s32.totalorder %v780_v45, %v4585_v6 }
  0xf5   : > { %3392 = vmatprep.mubr.bf16.mxu0 %v557_v35  ;;  %3409 = vmatpush3.bf16.msra.mxu0 %v3742_v33  ;;  %v3756_v33 = vld [vmem:[#allocation10 + $0x70] sm:$0xff]   ;;  %vm4724_vm0 = vmpackc.low %vm4704_vm14, %vm4672_vm4 }
  0xf6   : > { %3410 = vmatprep.subr.bf16.mxu0 %v3745_v53 }
  0xf9   : > { %3411 = vmatpush3.bf16.msra.mxu0 %v3745_v53  ;;  %v779_v53 = vadd.s32 72, %v4576_v1 }
  0xfa   : > { %3412 = vmatprep.subr.bf16.mxu0 %v3748_v56 }
  0xfb   : > { %vm805_vm7 = vcmp.ge.s32.totalorder %v779_v53, %v4585_v6 }
  0xfc   : > { %3393 = vmatmul.mubr.bf16.gmra.mxu0 %v558_v40 }
  0xfd   : > { %3396 = vmatprep.mubr.bf16.mxu0 %v559_v41  ;;  %3413 = vmatpush3.bf16.msra.mxu0 %v3748_v56  ;;  %v3760_v41 = vld [vmem:[#allocation10 + $0x68] sm:$0xff]  }
  0xfe   : > { %3414 = vmatprep.subr.bf16.mxu0 %v3751_v59 }
 0x101   : > { %3415 = vmatpush3.bf16.msra.mxu0 %v3751_v59 }
 0x102   : > { %3416 = vmatprep.subr.bf16.mxu0 %v3753_v60 }
 0x104   : > { %3397 = vmatmul.mubr.bf16.gmra.mxu0 %v560_v46 }
 0x105   : > { %3400 = vmatprep.mubr.bf16.mxu0 %v561_v47  ;;  %3417 = vmatpush3.bf16.msra.mxu0 %v3753_v60 }
 0x106   : > { %3418 = vmatprep.subr.bf16.mxu0 %v3755_v61 }
 0x109   : > { %3419 = vmatpush3.bf16.msra.mxu0 %v3755_v61 }
 0x10a   : > { %3436 = vmatprep.subr.bf16.mxu0 %v4572_v62 }
 0x10c   : > { %3401 = vmatmul.mubr.bf16.gmra.mxu0 %v564_v50 }
 0x1ac   : > { %v3386_v4 = vpop.f32.mrf.mxu0 }
 0x1ad   : > { %v4593_v10 = vadd.f32 %v3386_v4, %v4583_v5  ;;  %v3764_v4 = vld [vmem:[#allocation10 + $0x60] sm:$0xff]  }
 0x1ae   : > { %v670_v9 = vpop.f32.mrf.mxu0 }
 0x1af   : > { %v4600_v12 = vadd.f32 %v4583_v5, %v670_v9  ;;  %v5793_v17 = vmax.f32 %v4593_v10, 0.0  ;;  %v782_v9 = vadd.s32 96, %v4576_v1 }
 0x1b0   : > { %v3387_v11 = vpop.f32.mrf.mxu0 }
 0x1b1   : > { %v4603_v13 = vadd.f32 %v3387_v11, %v4583_v5  ;;  %v5791_v23 = vmax.f32 %v4600_v12, 0.0 }
 0x1b2   : > { %v673_v15 = vpop.f32.mrf.mxu0 }
 0x1b3   : > { %v5795_v18 = vmax.f32 %v4603_v13, 0.0  ;;  %v4620_v19 = vadd.f32 %v4583_v5, %v673_v15 }
 0x1b4   : > { %v3390_v21 = vpop.f32.mrf.mxu0 }
 0x1b5   : > { %v5792_v25 = vmax.f32 %v4620_v19, 0.0  ;;  %v4641_v26 = vpack.c.bf16 %v5795_v18, %v5793_v17  ;;  %v4670_v38 = vadd.f32 %v3390_v21, %v4583_v5  ;;  %v3773_v17 = vld [vmem:[#allocation10 + $0x10] sm:$0xff]   ;;  %v5931_v18 = vmov 0 }
 0x1b6   : > { %v686_v28 = vpop.f32.mrf.mxu0 }
 0x1b7   : > { %v2788_v31 = vpack.c.bf16 %v5792_v25, %v5791_v23  ;;  %2786 = vmatprep.mubr.msk.bf16.mxu1 %vm5784_vm11, %v4641_v26  ;;  %v4665_v35 = vadd.f32 %v4583_v5, %v686_v28  ;;  %v5798_v54 = vmax.f32 %v4670_v38, 0.0  ;;  %vm826_vm11 = vcmp.lt.s32.totalorder %v779_v53, %v4587_v7 }
 0x1b8   : > { %v3391_v34 = vpop.f32.mrf.mxu0  ;;  %v5924_v23 = vmov 0  ;;  %v789_v25 = vadd.s32 152, %v4576_v1  ;;  %v5958_v15 = vmax.f32 %v4670_v38, 0.0 }
 0x1b9   : > { %2789 = vmatmul.mubr.msk.bf16.vlgmr.msra.gmra.mxu1 %vm2787_vm13, %v2788_v31  ;;  %v4677_v40 = vadd.f32 %v3391_v34, %v4583_v5  ;;  %vm4697_vm13 = vmand %vm800_vm2, %vm821_vm3  ;;  %v753_v49 = vmax.f32 %v4665_v35, 0.0  ;;  %vm827_vm2 = vcmp.lt.s32.totalorder %v780_v45, %v4587_v7 }
 0x1ba   : > { %v689_v36 = vpop.f32.mrf.mxu0  ;;  %3193 = vmatpush3.bf16.msra.mxu1 %v3754_v30  ;;  %vm4716_vm15 = vmpackc.low %vm4688_vm8, %vm4697_vm13  ;;  %v3762_v30 = vld [vmem:[#allocation10 + $0xa8] sm:$0xff]  }
 0x1bb   : > { %3194 = vmatprep.subr.bf16.mxu1 %v3756_v33  ;;  %v4682_v42 = vadd.f32 %v4583_v5, %v689_v36  ;;  %v756_v47 = vmax.f32 %v4677_v40, 0.0  ;;  %vm4760_vm3 = vmand %vm806_vm1, %vm827_vm2  ;;  %vm5905_vm1 = vcmp.lt.s32.totalorder %v778_v48, %v4587_v7  ;;  %vm5906_vm2 = vcmp.ge.s32.totalorder %v778_v48, %v4585_v6  ;;  %v3768_v36 = vld [vmem:[#allocation10 + $0x58] sm:$0xff]  }
 0x1bc   : > { %v3394_v44 = vpop.f32.mrf.mxu0  ;;  %v5903_v8 = vsel %vm4760_vm3, 4294967295, %v5902_v8  ;;  %vm4781_vm5 = vmand %vm5906_vm2, %vm5905_vm1  ;;  %vm5911_vm1 = vcmp.ge.s32.totalorder %v781_v55, %v4585_v6  ;;  %v784_v33 = vadd.s32 112, %v4576_v1 }
 0x1bd   : > { %v754_v51 = vmax.f32 %v4682_v42, 0.0  ;;  %v4735_v59 = vadd.f32 %v3394_v44, %v4583_v5  ;;  %v4743_v61 = vpack.c.bf16 %v756_v47, %v5798_v54  ;;  %vm4810_vm2 = vmand %vm5911_vm1, %vm828_vm12  ;;  %vm5918_vm1 = vcmp.lt.s32.totalorder %v782_v9, %v4587_v7  ;;  %v3766_v54 = vld [vmem:[#allocation10 + $0x98] sm:$0xff]   ;;  %v3779_v42 = vld [vmem:[#allocation10 + $0x8] sm:$0xff]  }
 0x1be   : > { %v702_v52 = vpop.f32.mrf.mxu0  ;;  %3195 = vmatpush3.bf16.msra.mxu1 %v3757_v37  ;;  %v5913_v32 = vsel %vm4810_vm2, 4294967295, %v5912_v32  ;;  %vm4851_vm12 = vmpackc.low %vm4810_vm2, %vm4760_vm3  ;;  %vm831_vm6 = vcmp.lt.s32.totalorder %v784_v33, %v4587_v7 }
 0x1bf   : > { %3196 = vmatprep.subr.bf16.mxu1 %v3760_v41  ;;  %v4732_v58 = vpack.c.bf16 %v754_v51, %v753_v49  ;;  %v4746_v63 = vadd.f32 %v4583_v5, %v702_v52  ;;  %v5797_v11 = vmax.f32 %v4735_v59, 0.0  ;;  %v785_v41 = vadd.s32 120, %v4576_v1 }
 0x1c0   : > { %v3395_v60 = vpop.f32.mrf.mxu0  ;;  %v5960_v43 = vmax.f32 %v4735_v59, 0.0 }
 0x1c1   : > { %2792 = vmatprep.mubr.msk.bf16.mxu1 %vm4716_vm15, %v4732_v58  ;;  %3420 = vmatprep.mubr.msk.bf16.mxu0 %vm4716_vm15, %v4732_v58  ;;  %v4786_v21 = vadd.f32 %v3395_v60, %v4583_v5  ;;  %v3780_v60 = vld [vmem:[#allocation10 + $0x1e8] sm:$0xff]  }
 0x1c2   : > { %v705_v3 = vpop.f32.mrf.mxu0  ;;  %2795 = vmatmul.mubr.msk.bf16.gmra.mxu1 %vm5904_vm10, %v4641_v26  ;;  %3421 = vmatmul.mubr.msk.bf16.vlgmr.msra.gmra.mxu0 %vm4724_vm0, %v4743_v61  ;;  %v5800_v26 = vmax.f32 %v4746_v63, 0.0  ;;  %vm4800_vm10 = vmand %vm805_vm7, %vm826_vm11  ;;  %vm5919_vm11 = vcmp.ge.s32.totalorder %v782_v9, %v4585_v6  ;;  %v788_v9 = vadd.s32 144, %v4576_v1 }
 0x1c3   : > { %2798 = vmatprep.mubr.msk.bf16.mxu1 %vm4724_vm0, %v4743_v61  ;;  %3437 = vmatpush3.bf16.msra.mxu0 %v4572_v62  ;;  %v4794_v27 = vadd.f32 %v4583_v5, %v705_v3  ;;  %v3765_v62 = vld [vmem:[#allocation10 + $0x20] sm:$0xff]   ;;  %v5796_v31 = vmax.f32 %v4786_v21, 0.0  ;;  %vm4835_vm7 = vmpackc.low %vm4800_vm10, %vm4781_vm5 }
 0x1c4   : > { %v3398_v22 = vpop.f32.mrf.mxu0  ;;  %3438 = vmatprep.subr.bf16.mxu0 %v3759_v0  ;;  %3197 = vmatpush3.bf16.msra.mxu1 %v3761_v2  ;;  %v3763_v3 = vld [vmem:[#allocation10 + $0xa0] sm:$0xff]   ;;  %vm4861_vm4 = vmand %vm5919_vm11, %vm5918_vm1  ;;  %vm5922_vm11 = vcmp.lt.s32.totalorder %v783_v29, %v4587_v7  ;;  %vm5923_vm1 = vcmp.ge.s32.totalorder %v783_v29, %v4585_v6  ;;  %v5927_v29 = vmov 0 }
 0x1c5   : > { %3198 = vmatprep.subr.bf16.mxu1 %v3764_v4  ;;  %v5799_v37 = vmax.f32 %v4794_v27, 0.0  ;;  %v4822_v44 = vpack.c.bf16 %v5796_v31, %v5797_v11  ;;  %v4825_v45 = vadd.f32 %v3398_v22, %v4583_v5  ;;  %v3772_v4 = vld [vmem:[#allocation10 + $0x50] sm:$0xff]   ;;  %v5920_v22 = vmov 0  ;;  %vm4886_vm2 = vmand %vm5923_vm1, %vm5922_vm11 }
 0x1c6   : > { %v718_v34 = vpop.f32.mrf.mxu0  ;;  %v5921_v22 = vsel %vm4861_vm4, 4294967295, %v5920_v22  ;;  %v5925_v23 = vsel %vm4886_vm2, 4294967295, %v5924_v23  ;;  %vm5929_vm11 = vcmp.lt.s32.totalorder %v785_v41, %v4587_v7  ;;  %vm5930_vm1 = vcmp.ge.s32.totalorder %v785_v41, %v4585_v6 }
 0x1c7   : > { %v4828_v48 = vadd.f32 %v4583_v5, %v718_v34  ;;  %3439 = vmatpush3.bf16.msra.mxu0 %v3759_v0  ;;  %v4843_v55 = vpack.c.bf16 %v5799_v37, %v5800_v26  ;;  %v3769_v0 = vld [vmem:[#allocation10 + $0x18] sm:$0xff]   ;;  %vm4911_vm3 = vmand %vm5930_vm1, %vm5929_vm11  ;;  %v4950_v37 = vsel %vm4688_vm8, %v754_v51, 0.0  ;;  %vm5937_vm8 = vcmp.lt.s32.totalorder %v788_v9, %v4587_v7 }
 0x1c8   : > { %v3399_v52 = vpop.f32.mrf.mxu0  ;;  %3440 = vmatprep.subr.bf16.mxu0 %v3762_v30  ;;  %3199 = vmatpush3.bf16.msra.mxu1 %v3765_v62  ;;  %v5804_v62 = vmax.f32 %v4825_v45, 0.0  ;;  %v5932_v18 = vsel %vm4911_vm3, 4294967295, %v5931_v18  ;;  %vm4929_vm11 = vmpackc.low %vm4886_vm2, %vm4861_vm4  ;;  %vm5938_vm1 = vcmp.ge.s32.totalorder %v788_v9, %v4585_v6  ;;  %v4981_v9 = vsel %vm4697_vm13, %v753_v49, 0.0 }
 0x1c9   : > { %3200 = vmatprep.subr.bf16.mxu1 %v3768_v36  ;;  %v4866_v34 = vadd.f32 %v3399_v52, %v4583_v5  ;;  %3424 = vmatprep.mubr.msk.bf16.mxu0 %vm4835_vm7, %v4843_v55  ;;  %v5810_v36 = vmax.f32 %v4828_v48, 0.0  ;;  %vm4967_vm4 = vmand %vm5938_vm1, %vm5937_vm8  ;;  %vm1018_vm1 = vcmask 1046528  }
 0x1ca   : > { %v721_v2 = vpop.f32.mrf.mxu0  ;;  %2801 = vmatmul.mubr.msk.bf16.gmra.mxu1 %vm4716_vm15, %v4732_v58  ;;  %3425 = vmatmul.mubr.msk.bf16.gmra.mxu0 %vm4851_vm12, %v4822_v44  ;;  %v786_v58 = vadd.s32 128, %v4576_v1  ;;  %vm5926_vm15 = vcmp.ge.s32.totalorder %v784_v33, %v4585_v6 }
 0x1cb   : > { %v4880_v52 = vadd.f32 %v4583_v5, %v721_v2  ;;  %2804 = vmatprep.mubr.msk.bf16.mxu1 %vm4835_vm7, %v4843_v55  ;;  %vm4901_vm9 = vmand %vm5926_vm15, %vm831_vm6  ;;  %v5802_v2 = vmax.f32 %v4866_v34, 0.0  ;;  %3441 = vmatpush3.bf16.msra.mxu0 %v3762_v30  ;;  %v787_v30 = vadd.s32 136, %v4576_v1 }
 0x1cc   : > { %v3402_v56 = vpop.f32.mrf.mxu0  ;;  %v5928_v29 = vsel %vm4901_vm9, 4294967295, %v5927_v29  ;;  %3201 = vmatpush3.bf16.msra.mxu1 %v3769_v0  ;;  %3442 = vmatprep.subr.bf16.mxu0 %v3763_v3  ;;  %vm4959_vm2 = vmpackc.low %vm4911_vm3, %vm4901_vm9  ;;  %vm5941_vm8 = vcmp.lt.s32.totalorder %v786_v58, %v4587_v7  ;;  %vm5942_vm13 = vcmp.ge.s32.totalorder %v786_v58, %v4585_v6  ;;  %v3785_v58 = vld [vmem:[#allocation10] sm:$0xff]   ;;  %vm5948_vm3 = vcmp.lt.s32.totalorder %v789_v25, %v4587_v7 }
 0x1cd   : > { %v5805_v33 = vmax.f32 %v4880_v52, 0.0  ;;  %v4917_v31 = vadd.f32 %v3402_v56, %v4583_v5  ;;  %3202 = vmatprep.subr.bf16.mxu1 %v3772_v4  ;;  %v3778_v56 = vld [vmem:[#allocation10 + $0x48] sm:$0xff]   ;;  %v4937_v1 = vpack.c.bf16 %v5802_v2, %v5804_v62  ;;  %v5935_v2 = vmov 0  ;;  %vm4997_vm15 = vmand %vm5942_vm13, %vm5941_vm8  ;;  %v3783_v0 = vld [vmem:[#allocation10 + $0x1a0] sm:$0xff]  }
 0x1ce   : > { %v734_v11 = vpop.f32.mrf.mxu0  ;;  %v5936_v2 = vsel %vm4959_vm2, 4294967295, %v5935_v2  ;;  %vm834_vm6 = vcmp.lt.s32.totalorder %v787_v30, %v4587_v7  ;;  %vm937_vm13 = vcmask 1040384   ;;  %vm5949_vm9 = vcmp.ge.s32.totalorder %v789_v25, %v4585_v6 }
 0x1cf   : > { %v4923_v41 = vadd.f32 %v4583_v5, %v734_v11  ;;  %v4943_v11 = vpack.c.bf16 %v5805_v33, %v5810_v36  ;;  %v767_v26 = vmax.f32 %v4917_v31, 0.0  ;;  %3443 = vmatpush3.bf16.msra.mxu0 %v3763_v3  ;;  %v3784_v3 = vld [vmem:[#allocation10 + $0x40] sm:$0xff]   ;;  %v945_v33 = vrot.slane %v4950_v37, 7 }
 0x1d0   : > { %v3403_v4 = vpop.f32.mrf.mxu0  ;;  %3203 = vmatpush3.bf16.msra.mxu1 %v3773_v17  ;;  %3444 = vmatprep.subr.bf16.mxu0 %v3766_v54  ;;  %v3767_v17 = vld [vmem:[#allocation10 + $0x90] sm:$0xff]   ;;  %v5041_v7 = vsel %vm4704_vm14, %v756_v47, 0.0  ;;  %v5954_v47 = vmax.f32 %v4746_v63, 0.0  ;;  %v5966_v59 = vmax.f32 %v4880_v52, 0.0  ;;  %v3802_v63 = vld [vmem:[#allocation11 + $0x38] sm:$0xff]  }
 0x1d1   : > { %v746_v51 = vadd.f32 %v3403_v4, %v4583_v5  ;;  %3428 = vmatprep.mubr.msk.bf16.mxu0 %vm4929_vm11, %v4943_v11  ;;  %v4985_v4 = vsel %vm4967_vm4, %v767_v26, 0.0  ;;  %v765_v62 = vmax.f32 %v4923_v41, 0.0  ;;  %3204 = vmatprep.subr.bf16.mxu1 %v3778_v56  ;;  %v944_v41 = vrot.slane %v4981_v9, 7 }
 0x1d2   : > { %v737_v31 = vpop.f32.mrf.mxu0  ;;  %2807 = vmatmul.mubr.msk.bf16.gmra.mxu1 %vm4724_vm0, %v4743_v61  ;;  %3429 = vmatmul.mubr.msk.bf16.gmra.mxu0 %vm4959_vm2, %v4937_v1  ;;  %vm5945_vm0 = vcmp.ge.s32.totalorder %v787_v30, %v4585_v6  ;;  %v1046_v56 = vrot.slane %v4985_v4, 1  ;;  %vm5026_vm2 = vmand %vm5949_vm9, %vm5948_vm3  ;;  %v3770_v30 = vld [vmem:[#allocation10 + $0x88] sm:$0xff]   ;;  %v5058_v50 = vsel %vm4781_vm5, %v5954_v47, 0.0  ;;  %vm4160_vm3 = vmmov 1  }
 0x1d3   : > { %2810 = vmatprep.mubr.msk.bf16.mxu1 %vm4851_vm12, %v4822_v44  ;;  %v5009_v46 = vsel %vm4997_vm15, %v765_v62, 0.0  ;;  %v768_v49 = vmax.f32 %v746_v51, 0.0  ;;  %v738_v57 = vadd.f32 %v4583_v5, %v737_v31  ;;  %vm5016_vm8 = vmand %vm5945_vm0, %vm834_vm6  ;;  %3445 = vmatpush3.bf16.msra.mxu0 %v3766_v54  ;;  %v5030_v54 = vld [vmem:[#allocation10 + $0x238] sm:$0xff]   ;;  %v946_v40 = vsel %vm937_vm13, %v944_v41, %v945_v33  ;;  %v3771_v33 = vld [vmem:[#allocation10 + $0x80] sm:$0xff]  }
 0x1d4   : > { %3205 = vmatpush3.bf16.msra.mxu1 %v3779_v42  ;;  %3446 = vmatprep.subr.bf16.mxu0 %v3767_v17  ;;  %vm5033_vm6 = vmneg %vm937_vm13  ;;  %v1043_v51 = vrot.slane %v5009_v46, 1  ;;  %v5104_v38 = vpack.c.bf16 %v946_v40, %v944_v41  ;;  %v3774_v41 = vld [vmem:[#allocation10 + $0x1f8] sm:$0xff]   ;;  %vm5967_vm0 = vnez %v5925_v23 }
 0x1d5   : > { %3206 = vmatprep.subr.bf16.mxu1 %v3784_v3  ;;  %v5045_v6 = vsel %vm5026_vm2, %v768_v49, 0.0  ;;  %v766_v25 = vmax.f32 %v738_v57, 0.0  ;;  %v2854_v3 = vpack.c.bf16 %v768_v49, %v767_v26  ;;  %vm2826_vm9 = vmpackc.low %vm5016_vm8, %vm4997_vm15  ;;  %v5955_v57 = vmax.f32 %v4794_v27, 0.0 }
 0x1d6   : > { %v1047_v31 = vrot.slane %v5045_v6, 1  ;;  %vm2853_vm14 = vmpackc.low %vm5026_vm2, %vm4967_vm4  ;;  %vm5961_vm4 = vnez %v5903_v8  ;;  %vm5963_vm2 = vnez %v5913_v32  ;;  %v5147_v8 = vsel %vm5967_vm0, %v5966_v59, 0.0  ;;  %v3776_v32 = vld [vmem:[#allocation10 + $0x1f0] sm:$0xff]  }
 0x1d7   : > { %v5064_v36 = vsel %vm4800_vm10, %v5955_v57, 0.0  ;;  %v5068_v26 = vsel %vm5016_vm8, %v766_v25, 0.0  ;;  %v5070_v49 = vpack.c.bf16 %v766_v25, %v765_v62  ;;  %3447 = vmatpush3.bf16.msra.mxu0 %v3767_v17  ;;  %vm5079_vm5 = vmpackc.low %vm4160_vm3, %vm5033_vm6  ;;  %vm5959_vm10 = vnez %v5891_v39 }
 0x1d8   : > { %3207 = vmatpush3.bf16.msra.mxu1 %v3785_v58  ;;  %v5087_v27 = vsel %vm5959_vm10, %v5958_v15, 0.0  ;;  %v1048_v28 = vsel %vm1018_vm1, %v1046_v56, %v1047_v31  ;;  %v1044_v62 = vrot.slane %v5068_v26, 1  ;;  %3448 = vmatprep.subr.bf16.mxu0 %v3770_v30  ;;  %v948_v17 = vrot.slane %v5041_v7, 7  ;;  %vm5251_vm8 = vmpackc.low %vm1018_vm1, %vm4160_vm3 }
 0x1d9   : > { %3468 = vmatprep.subr.bf16.mxu1 %v5030_v54  ;;  %v5093_v58 = vpack.c.bf16 %v1047_v31, %v1048_v28  ;;  %3432 = vmatprep.mubr.msk.bf16.mxu0 %vm2826_vm9, %v5070_v49  ;;  %v950_v39 = vrot.slane %v5058_v50, 7  ;;  %v951_v56 = vrot.slane %v5064_v36, 7  ;;  %v947_v53 = vrot.slane %v5087_v27, 7 }
 0x1da   : > { %2813 = vmatmul.mubr.msk.bf16.gmra.mxu1 %vm4835_vm7, %v4843_v55  ;;  %v1045_v42 = vsel %vm1018_vm1, %v1043_v51, %v1044_v62  ;;  %3433 = vmatmul.mubr.msk.bf16.gmra.mxu0 %vm2853_vm14, %v2854_v3  ;;  %v5128_v25 = vsel %vm5961_vm4, %v5960_v43, 0.0  ;;  %v5962_v51 = vmax.f32 %v4786_v21, 0.0  ;;  %v5964_v3 = vmax.f32 %v4828_v48, 0.0  ;;  %v3775_v21 = vld [vmem:[#allocation10 + $0x1b8] sm:$0xff]  }
 0x1db   : > { %2816 = vmatprep.mubr.msk.bf16.mxu1 %vm4929_vm11, %v4943_v11  ;;  %v5118_v55 = vpack.c.bf16 %v1044_v62, %v1045_v42  ;;  %3449 = vmatpush3.bf16.msra.mxu0 %v3770_v30  ;;  %v949_v5 = vsel %vm937_vm13, %v947_v53, %v948_v17  ;;  %v952_v30 = vsel %vm937_vm13, %v950_v39, %v951_v56  ;;  %v953_v57 = vrot.slane %v5128_v25, 7 }
 0x1dc   : > { %3452 = vmatprep.mubr.msk.bf16.mxu0 %vm5079_vm5, %v5104_v38  ;;  %3450 = vmatprep.subr.bf16.mxu0 %v3771_v33  ;;  %v5134_v31 = vsel %vm5963_vm2, %v5962_v51, 0.0  ;;  %vm5965_vm7 = vnez %v5921_v22  ;;  %v5149_v47 = vpack.c.bf16 %v949_v5, %v947_v53  ;;  %v5156_v22 = vpack.c.bf16 %v952_v30, %v950_v39 }
 0x1dd   : > { %v5141_v40 = vsel %vm5965_vm7, %v5964_v3, 0.0  ;;  %v954_v48 = vrot.slane %v5134_v31, 7  ;;  %v957_v52 = vrot.slane %v5147_v8, 7  ;;  %vm5968_vm6 = vnez %v5936_v2  ;;  %v3787_v3 = vld [vmem:[#allocation10 + $0x198] sm:$0xff]  }
 0x1de   : > { %v956_v23 = vrot.slane %v5141_v40, 7  ;;  %v5969_v28 = vmax.f32 %v4603_v13, 0.0  ;;  %vm5972_vm14 = vnez %v5928_v29  ;;  %v5973_v39 = vmax.f32 %v4866_v34, 0.0  ;;  %v3781_v13 = vld [vmem:[#allocation10 + $0x1a8] sm:$0xff]   ;;  %v3782_v29 = vld [vmem:[#allocation10 + $0x1e0] sm:$0xff]  }
 0x1df   : > { %3451 = vmatpush3.bf16.msra.mxu0 %v3771_v33  ;;  %v955_v15 = vsel %vm937_vm13, %v953_v57, %v954_v48  ;;  %v5971_v33 = vmax.f32 %v4825_v45, 0.0  ;;  %vm5974_vm10 = vnez %v5932_v18  ;;  %vm5976_vm4 = vnez %v5885_v16 }
 0x1e0   : > { %3272 = vmatprep.subr.bf16.mxu0 %v3774_v41  ;;  %v5186_v56 = vsel %vm5974_vm10, %v5973_v39, 0.0  ;;  %v958_v42 = vsel %vm937_vm13, %v956_v23, %v957_v52  ;;  %v5193_v45 = vpack.c.bf16 %v955_v15, %v953_v57  ;;  %v963_v16 = vrot.slane %v5068_v26, 7  ;;  %v3795_v39 = vld [vmem:[#allocation10 + $0x230] sm:$0xff]  }
 0x1e1   : > { %v5180_v17 = vsel %vm5972_vm14, %v5971_v33, 0.0  ;;  %v960_v18 = vrot.slane %v5186_v56, 7  ;;  %v5201_v5 = vpack.c.bf16 %v958_v42, %v956_v23  ;;  %v5979_v51 = vmax.f32 %v4600_v12, 0.0 }
 0x1e2   : > { %2819 = vmatmul.mubr.msk.bf16.gmra.mxu1 %vm4851_vm12, %v4822_v44  ;;  %3453 = vmatmul.mubr.msk.bf16.vlgmr.msra.gmra.mxu0 %vm5079_vm5, %v5149_v47  ;;  %v3777_v44 = vld [vmem:[#allocation10 + $0x1b0] sm:$0xff]   ;;  %vm5970_vm12 = vnez %v5883_v14  ;;  %v5975_v14 = vmax.f32 %v4593_v10, 0.0  ;;  %v959_v34 = vrot.slane %v5180_v17, 7  ;;  %v962_v10 = vrot.slane %v5009_v46, 7 }
 0x1e3   : > { %2822 = vmatprep.mubr.msk.bf16.mxu1 %vm5968_vm6, %v4937_v1  ;;  %3456 = vmatprep.mubr.msk.bf16.mxu0 %vm5079_vm5, %v5156_v22  ;;  %v5174_v62 = vsel %vm5970_vm12, %v5969_v28, 0.0  ;;  %v5977_v46 = vmax.f32 %v4620_v19, 0.0  ;;  %vm5980_vm15 = vnez %v5889_v24  ;;  %v3788_v19 = vld [vmem:[#allocation10 + $0x1d0] sm:$0xff]   ;;  %v966_v57 = vrot.slane %v5045_v6, 7  ;;  %v3793_v28 = vld [vmem:[#allocation10 + $0x1c0] sm:$0xff]  }
 0x1e4   : > { %3273 = vmatpush3.bf16.msra.mxu0 %v3775_v21  ;;  %v899_v53 = vsel %vm5976_vm4, %v5975_v14, 0.0  ;;  %v942_v41 = vrot.slane %v5174_v62, 7  ;;  %v961_v35 = vsel %vm937_vm13, %v959_v34, %v960_v18  ;;  %v897_v30 = vsel %vm5980_vm15, %v5979_v51, 0.0  ;;  %v3797_v18 = vld [vmem:[#allocation10 + $0x220] sm:$0xff]  }
 0x1e5   : > { %3274 = vmatprep.subr.bf16.mxu0 %v3776_v32  ;;  %v941_v43 = vrot.slane %v899_v53, 7  ;;  %v5228_v32 = vpack.c.bf16 %v961_v35, %v959_v34  ;;  %v938_v24 = vrot.slane %v897_v30, 7  ;;  %v1023_v48 = vrot.slane %v5174_v62, 1 }
 0x1e6   : > { %v1022_v6 = vrot.slane %v899_v53, 1  ;;  %v1019_v14 = vrot.slane %v897_v30, 1  ;;  %v3794_v53 = vld [vmem:[#allocation10 + $0x180] sm:$0xff]   ;;  %v1035_v35 = vrot.slane %v5134_v31, 1  ;;  %v1038_v31 = vrot.slane %v5147_v8, 1 }
 0x1e7   : > { %v943_v61 = vsel %vm937_vm13, %v941_v43, %v942_v41  ;;  %v1025_v41 = vrot.slane %v4981_v9, 1  ;;  %v1029_v9 = vrot.slane %v5041_v7, 1  ;;  %v3799_v7 = vld [vmem:[#allocation10 + $0x210] sm:$0xff]   ;;  %v1041_v8 = vrot.slane %v5186_v56, 1  ;;  %v3804_v56 = vld [vmem:[#allocation11 + $0x28] sm:$0xff]  }
 0x1e8   : > { %3275 = vmatpush3.bf16.msra.mxu0 %v3777_v44  ;;  %v2882_v21 = vpack.c.bf16 %v943_v61, %v941_v43  ;;  %v1024_v44 = vsel %vm1018_vm1, %v1022_v6, %v1023_v48  ;;  %v3798_v43 = vld [vmem:[#allocation10 + $0x218] sm:$0xff]  }
 0x1e9   : > { %3276 = vmatprep.subr.bf16.mxu0 %v3780_v60  ;;  %v3792_v60 = vld [vmem:[#allocation10 + $0x188] sm:$0xff]   ;;  %v3001_v42 = vpack.c.bf16 %v1023_v48, %v1024_v44 }
 0x1ea   : > { %2825 = vmatmul.mubr.msk.bf16.gmra.mxu1 %vm4929_vm11, %v4943_v11  ;;  %3457 = vmatmul.mubr.msk.bf16.gmra.mxu0 %vm5079_vm5, %v5193_v45  ;;  %v3786_v11 = vld [vmem:[#allocation10 + $0x1d8] sm:$0xff]   ;;  %vm5978_vm11 = vnez %v5887_v20  ;;  %v965_v20 = vrot.slane %v4985_v4, 7  ;;  %v3789_v4 = vld [vmem:[#allocation10 + $0x190] sm:$0xff]  }
 0x1eb   : > { %2828 = vmatprep.mubr.msk.bf16.mxu1 %vm2826_vm9, %v5070_v49  ;;  %3460 = vmatprep.mubr.msk.bf16.mxu0 %vm5079_vm5, %v5201_v5  ;;  %v898_v26 = vsel %vm5978_vm11, %v5977_v46, 0.0  ;;  %v964_v49 = vsel %vm937_vm13, %v962_v10, %v963_v16  ;;  %v1028_v16 = vrot.slane %v5087_v27, 1  ;;  %v1031_v46 = vrot.slane %v5058_v50, 1  ;;  %v3800_v27 = vld [vmem:[#allocation10 + $0x208] sm:$0xff]   ;;  %v3801_v50 = vld [vmem:[#allocation10 + $0x200] sm:$0xff]  }
 0x1ec   : > { %3277 = vmatpush3.bf16.msra.mxu0 %v3781_v13  ;;  %v939_v59 = vrot.slane %v898_v26, 7  ;;  %v5235_v12 = vpack.c.bf16 %v964_v49, %v962_v10  ;;  %v967_v23 = vsel %vm937_vm13, %v965_v20, %v966_v57  ;;  %v1020_v62 = vrot.slane %v898_v26, 1 }
 0x1ed   : > { %3278 = vmatprep.subr.bf16.mxu0 %v3782_v29  ;;  %v2974_v15 = vpack.c.bf16 %v967_v23, %v965_v20  ;;  %v1026_v13 = vrot.slane %v4950_v37, 1  ;;  %v3796_v29 = vld [vmem:[#allocation10 + $0x228] sm:$0xff]   ;;  %v1032_v26 = vrot.slane %v5064_v36, 1  ;;  %v1034_v36 = vrot.slane %v5128_v25, 1 }
 0x1ee   : > { %v940_v2 = vsel %vm937_vm13, %v938_v24, %v939_v59  ;;  %v1021_v37 = vsel %vm1018_vm1, %v1019_v14, %v1020_v62  ;;  %v1037_v25 = vrot.slane %v5141_v40, 1  ;;  %v1040_v40 = vrot.slane %v5180_v17, 1  ;;  %v3803_v17 = vld [vmem:[#allocation11 + $0x30] sm:$0xff]   ;;  %v3805_v59 = vld [vmem:[#allocation11 + $0x20] sm:$0xff]  }
 0x1ef   : > { %v2886_v52 = vpack.c.bf16 %v940_v2, %v938_v24  ;;  %v1027_v34 = vsel %vm1018_vm1, %v1025_v41, %v1026_v13  ;;  %v1033_v61 = vsel %vm1018_vm1, %v1031_v46, %v1032_v26  ;;  %v1036_v49 = vsel %vm1018_vm1, %v1034_v36, %v1035_v35 }
 0x1f0   : > { %3279 = vmatpush3.bf16.msra.mxu0 %v3783_v0  ;;  %v3007_v10 = vpack.c.bf16 %v1026_v13, %v1027_v34  ;;  %v1030_v0 = vsel %vm1018_vm1, %v1028_v16, %v1029_v9  ;;  %v1039_v51 = vsel %vm1018_vm1, %v1037_v25, %v1038_v31 }
 0x1f1   : > { %3280 = vmatprep.subr.bf16.mxu0 %v3786_v11  ;;  %v3013_v11 = vpack.c.bf16 %v1029_v9, %v1030_v0  ;;  %v3031_v30 = vpack.c.bf16 %v1038_v31, %v1039_v51 }
 0x1f2   : > { %2831 = vmatmul.mubr.msk.bf16.gmra.mxu1 %vm5968_vm6, %v4937_v1  ;;  %3461 = vmatmul.mubr.msk.bf16.gmra.mxu0 %vm5079_vm5, %v5228_v32  ;;  %v3791_v1 = vld [vmem:[#allocation10 + $0x1c8] sm:$0xff]  }
 0x1f3   : > { %2883 = vmatprep.mubr.msk.bf16.mxu1 %vm5079_vm5, %v2882_v21  ;;  %3464 = vmatprep.mubr.msk.bf16.mxu0 %vm5079_vm5, %v5235_v12 }
 0x1f4   : > { %3281 = vmatpush3.bf16.msra.mxu0 %v3787_v3 }
 0x1f5   : > { %3282 = vmatprep.subr.bf16.mxu0 %v3788_v19  ;;  %v3806_v19 = vld [vmem:[#allocation11 + $0x18] sm:$0xff]  }
 0x1f8   : > { %3283 = vmatpush3.bf16.msra.mxu0 %v3789_v4 }
 0x1f9   : > { %3284 = vmatprep.subr.bf16.mxu0 %v3791_v1 }
 0x1fa   : > { %2887 = vmatmul.mubr.msk.bf16.vlgmr.msra.gmra.mxu1 %vm5079_vm5, %v2886_v52  ;;  %3465 = vmatmul.mubr.msk.bf16.gmra.mxu0 %vm5079_vm5, %v2974_v15  ;;  %v3808_v52 = vld [vmem:[#allocation11 + $0x8] sm:$0xff]  }
 0x1fb   : > { %3469 = vmatpush3.bf16.msra.mxu1 %v5030_v54  ;;  %2891 = vmatprep.mubr.msk.bf16.mxu1 %vm5079_vm5, %v5104_v38  ;;  %v3004_v54 = vpack.c.bf16 %v1020_v62, %v1021_v37 }
 0x1fc   : > { %3285 = vmatpush3.bf16.msra.mxu0 %v3792_v60  ;;  %3002 = vmatprep.mubr.msk.bf16.mxu0 %vm5251_vm8, %v3001_v42 }
 0x1fd   : > { %3286 = vmatprep.subr.bf16.mxu0 %v3793_v28  ;;  %3470 = vmatprep.subr.bf16.mxu1 %v3795_v39 }
 0x1ff   : > { %3471 = vmatpush3.bf16.msra.mxu1 %v3795_v39 }
 0x200   : > { %3287 = vmatpush3.bf16.msra.mxu0 %v3794_v53  ;;  %3472 = vmatprep.subr.bf16.mxu1 %v3796_v29 }
 0x201   : > { %3500 = vmatprep.subr.bf16.mxu0 %v3802_v63 }
 0x202   : > { %2895 = vmatmul.mubr.msk.bf16.gmra.mxu1 %vm5079_vm5, %v2882_v21 }
 0x203   : > { %3005 = vmatmul.mubr.msk.bf16.vlgmr.msra.gmra.mxu0 %vm5251_vm8, %v3004_v54  ;;  %2899 = vmatprep.mubr.msk.bf16.mxu1 %vm5079_vm5, %v5149_v47 }
 0x204   : > { %3008 = vmatprep.mubr.msk.bf16.mxu0 %vm5251_vm8, %v3007_v10  ;;  %3473 = vmatpush3.bf16.msra.mxu1 %v3796_v29 }
 0x205   : > { %3474 = vmatprep.subr.bf16.mxu1 %v3797_v18  ;;  %3501 = vmatpush3.bf16.msra.mxu0 %v3802_v63 }
 0x206   : > { %3502 = vmatprep.subr.bf16.mxu0 %v3803_v17 }
 0x208   : > { %3475 = vmatpush3.bf16.msra.mxu1 %v3797_v18 }
 0x209   : > { %3476 = vmatprep.subr.bf16.mxu1 %v3798_v43  ;;  %3503 = vmatpush3.bf16.msra.mxu0 %v3803_v17 }
 0x20a   : > { %2903 = vmatmul.mubr.msk.bf16.gmra.mxu1 %vm5079_vm5, %v5104_v38  ;;  %v3019_v38 = vpack.c.bf16 %v1032_v26, %v1033_v61  ;;  %3504 = vmatprep.subr.bf16.mxu0 %v3804_v56 }
 0x20b   : > { %3011 = vmatmul.mubr.msk.bf16.gmra.mxu0 %vm5251_vm8, %v3001_v42  ;;  %2907 = vmatprep.mubr.msk.bf16.mxu1 %vm5079_vm5, %v5156_v22  ;;  %v3809_v42 = vld [vmem:[#allocation11] sm:$0xff]  }
 0x20c   : > { %3014 = vmatprep.mubr.msk.bf16.mxu0 %vm5251_vm8, %v3013_v11  ;;  %3477 = vmatpush3.bf16.msra.mxu1 %v3798_v43 }
 0x20d   : > { %3478 = vmatprep.subr.bf16.mxu1 %v3799_v7  ;;  %3505 = vmatpush3.bf16.msra.mxu0 %v3804_v56 }
 0x20e   : > { %3506 = vmatprep.subr.bf16.mxu0 %v3805_v59 }
 0x210   : > { %3479 = vmatpush3.bf16.msra.mxu1 %v3799_v7 }
 0x211   : > { %3480 = vmatprep.subr.bf16.mxu1 %v3800_v27  ;;  %3507 = vmatpush3.bf16.msra.mxu0 %v3805_v59 }
 0x212   : > { %2911 = vmatmul.mubr.msk.bf16.gmra.mxu1 %vm5079_vm5, %v5149_v47  ;;  %v3025_v47 = vpack.c.bf16 %v1035_v35, %v1036_v49  ;;  %3508 = vmatprep.subr.bf16.mxu0 %v3806_v19 }
 0x213   : > { %3017 = vmatmul.mubr.msk.bf16.gmra.mxu0 %vm5251_vm8, %v3007_v10  ;;  %2915 = vmatprep.mubr.msk.bf16.mxu1 %vm5079_vm5, %v5193_v45 }
 0x214   : > { %3020 = vmatprep.mubr.msk.bf16.mxu0 %vm5251_vm8, %v3019_v38  ;;  %3481 = vmatpush3.bf16.msra.mxu1 %v3800_v27 }
 0x215   : > { %3482 = vmatprep.subr.bf16.mxu1 %v3801_v50  ;;  %3509 = vmatpush3.bf16.msra.mxu0 %v3806_v19 }
 0x218   : > { %3483 = vmatpush3.bf16.msra.mxu1 %v3801_v50 }
 0x219   : > { %3532 = vmatprep.subr.bf16.mxu1 %v3802_v63 }
 0x21a   : > { %2919 = vmatmul.mubr.msk.bf16.gmra.mxu1 %vm5079_vm5, %v5156_v22  ;;  %v1042_v22 = vsel %vm1018_vm1, %v1040_v40, %v1041_v8 }
 0x21b   : > { %3023 = vmatmul.mubr.msk.bf16.gmra.mxu0 %vm5251_vm8, %v3013_v11  ;;  %2923 = vmatprep.mubr.msk.bf16.mxu1 %vm5079_vm5, %v5201_v5  ;;  %v3037_v3 = vpack.c.bf16 %v1041_v8, %v1042_v22 }
 0x21c   : > { %3026 = vmatprep.mubr.msk.bf16.mxu0 %vm5251_vm8, %v3025_v47 }
 0x222   : > { %2927 = vmatmul.mubr.msk.bf16.gmra.mxu1 %vm5079_vm5, %v5193_v45 }
 0x223   : > { %3029 = vmatmul.mubr.msk.bf16.gmra.mxu0 %vm5251_vm8, %v3019_v38  ;;  %2931 = vmatprep.mubr.msk.bf16.mxu1 %vm5079_vm5, %v5228_v32 }
 0x224   : > { %3032 = vmatprep.mubr.msk.bf16.mxu0 %vm5251_vm8, %v3031_v30 }
 0x22a   : > { %2935 = vmatmul.mubr.msk.bf16.gmra.mxu1 %vm5079_vm5, %v5201_v5 }
 0x22b   : > { %3035 = vmatmul.mubr.msk.bf16.gmra.mxu0 %vm5251_vm8, %v3025_v47  ;;  %2939 = vmatprep.mubr.msk.bf16.mxu1 %vm5079_vm5, %v5235_v12  ;;  %v3807_v12 = vld [vmem:[#allocation11 + $0x10] sm:$0xff]  }
 0x22c   : > { %3038 = vmatprep.mubr.msk.bf16.mxu0 %vm5251_vm8, %v3037_v3  ;;  %3510 = vmatprep.subr.bf16.mxu0 %v3807_v12 }
 0x22d   : > { %3511 = vmatpush3.bf16.msra.mxu0 %v3807_v12 }
 0x22e   : > { %3512 = vmatprep.subr.bf16.mxu0 %v3808_v52 }
 0x231   : > { %3513 = vmatpush3.bf16.msra.mxu0 %v3808_v52 }
 0x232   : > { %2943 = vmatmul.mubr.msk.bf16.gmra.mxu1 %vm5079_vm5, %v5228_v32  ;;  %3514 = vmatprep.subr.bf16.mxu0 %v3809_v42 }
 0x233   : > { %3041 = vmatmul.mubr.msk.bf16.gmra.mxu0 %vm5251_vm8, %v3031_v30  ;;  %3484 = vmatprep.mubr.msk.bf16.mxu1 %vm5251_vm8, %v3007_v10 }
 0x234   : > { %3044 = vmatprep.mubr.msk.bf16.mxu0 %vm5251_vm8, %v5118_v55 }
 0x235   : > { %3515 = vmatpush3.bf16.msra.mxu0 %v3809_v42 }
 0x23a   : > { %3485 = vmatmul.mubr.msk.bf16.vlgmr.msra.gmra.mxu1 %vm5251_vm8, %v3013_v11 }
 0x23b   : > { %3047 = vmatmul.mubr.msk.bf16.gmra.mxu0 %vm5251_vm8, %v3037_v3  ;;  %3488 = vmatprep.mubr.msk.bf16.mxu1 %vm5251_vm8, %v3019_v38 }
 0x23c   : > { %3540 = vmatpush3.bf16.msra.mxu1 %v3802_v63 }
 0x23d   : > { %3533 = vmatprep.subr.bf16.mxu1 %v3803_v17 }
 0x240   : > { %3541 = vmatpush3.bf16.msra.mxu1 %v3803_v17 }
 0x241   : > { %3534 = vmatprep.subr.bf16.mxu1 %v3804_v56 }
 0x242   : > { %3489 = vmatmul.mubr.msk.bf16.gmra.mxu1 %vm5251_vm8, %v3025_v47 }
 0x243   : > { %3492 = vmatprep.mubr.msk.bf16.mxu1 %vm5251_vm8, %v3031_v30 }
 0x244   : > { %3542 = vmatpush3.bf16.msra.mxu1 %v3804_v56 }
 0x245   : > { %3535 = vmatprep.subr.bf16.mxu1 %v3805_v59 }
 0x248   : > { %3543 = vmatpush3.bf16.msra.mxu1 %v3805_v59 }
 0x249   : > { %3536 = vmatprep.subr.bf16.mxu1 %v3806_v19 }
 0x24a   : > { %3493 = vmatmul.mubr.msk.bf16.gmra.mxu1 %vm5251_vm8, %v3037_v3 }
 0x24b   : > { %3496 = vmatprep.mubr.msk.bf16.mxu1 %vm5251_vm8, %v5118_v55 }
 0x24c   : > { %3544 = vmatpush3.bf16.msra.mxu1 %v3806_v19 }
 0x24d   : > { %3537 = vmatprep.subr.bf16.mxu1 %v3807_v12 }
 0x250   : > { %3545 = vmatpush3.bf16.msra.mxu1 %v3807_v12 }
 0x251   : > { %3538 = vmatprep.subr.bf16.mxu1 %v3808_v52 }
 0x252   : > { %3497 = vmatmul.mubr.msk.bf16.gmra.mxu1 %vm5251_vm8, %v5093_v58 }
 0x254   : > { %3546 = vmatpush3.bf16.msra.mxu1 %v3808_v52 }
 0x255   : > { %3539 = vmatprep.subr.bf16.mxu1 %v3809_v42 }
 0x258   : > { %3547 = vmatpush3.bf16.msra.mxu1 %v3809_v42 }
 0x279   : > { %v3128_v55 = vpop.f32.mrf.mxu1 }
 0x27b   : > { %v3129_v45 = vpop.f32.mrf.mxu1 }
 0x27c   : > { %v3130_v5 = vadd.f32 %v3129_v45, %v3128_v55 }
 0x27d   : > { %v3131_v58 = vpop.f32.mrf.mxu1 }
 0x27f   : > { %v3132_v21 = vpop.f32.mrf.mxu1 }
 0x280   : > { %v3133_v32 = vadd.f32 %v3132_v21, %v3131_v58 }
 0x282   : > { %v3134_v20 = vpop.f32.mrf.mxu1  ;;  %v3422_v57 = vpop.f32.mrf.mxu0 }
 0x284   : > { %v3135_v24 = vpop.f32.mrf.mxu1  ;;  %v1461_v48 = vpop.f32.mrf.mxu0 }
 0x285   : > { %v3136_v4 = vadd.f32 %v3135_v24, %v3134_v20  ;;  %v5371_v2 = vadd.f32 %v3130_v5, %v1461_v48 }
 0x286   : > { %v3137_v1 = vpop.f32.mrf.mxu1  ;;  %v3423_v6 = vpop.f32.mrf.mxu0 }
 0x287   : > { %v5373_v23 = vadd.f32 %v3422_v57, %v3136_v4 }
 0x288   : > { %v3138_v44 = vpop.f32.mrf.mxu1  ;;  %v1464_v60 = vpop.f32.mrf.mxu0 }
 0x289   : > { %v3139_v15 = vadd.f32 %v3138_v44, %v3137_v1  ;;  %v5375_v28 = vadd.f32 %v3133_v32, %v1464_v60 }
 0x28a   : > { %v3140_v62 = vpop.f32.mrf.mxu1  ;;  %v3426_v39 = vpop.f32.mrf.mxu0 }
 0x28b   : > { %v5377_v33 = vadd.f32 %v3423_v6, %v3139_v15 }
 0x28c   : > { %v3141_v13 = vpop.f32.mrf.mxu1  ;;  %v1477_v53 = vpop.f32.mrf.mxu0 }
 0x28d   : > { %v3142_v14 = vadd.f32 %v3141_v13, %v3140_v62 }
 0x28e   : > { %v3143_v29 = vpop.f32.mrf.mxu1  ;;  %v3427_v37 = vpop.f32.mrf.mxu0 }
 0x28f   : > { %v5379_v41 = vadd.f32 %v3142_v14, %v1477_v53 }
 0x290   : > { %v3144_v34 = vpop.f32.mrf.mxu1  ;;  %v1480_v18 = vpop.f32.mrf.mxu0 }
 0x291   : > { %v3145_v54 = vadd.f32 %v3144_v34, %v3143_v29 }
 0x292   : > { %v3146_v10 = vpop.f32.mrf.mxu1  ;;  %v3430_v16 = vpop.f32.mrf.mxu0 }
 0x293   : > { %v5381_v9 = vadd.f32 %v3145_v54, %v1480_v18 }
 0x294   : > { %v3147_v43 = vpop.f32.mrf.mxu1  ;;  %v1493_v7 = vpop.f32.mrf.mxu0 }
 0x295   : > { %v3148_v0 = vadd.f32 %v3147_v43, %v3146_v10 }
 0x296   : > { %v3149_v11 = vpop.f32.mrf.mxu1  ;;  %v3431_v26 = vpop.f32.mrf.mxu0 }
 0x297   : > { %v5383_v46 = vadd.f32 %v3426_v39, %v3148_v0 }
 0x298   : > { %v3150_v27 = vpop.f32.mrf.mxu1  ;;  %v1496_v50 = vpop.f32.mrf.mxu0 }
 0x299   : > { %v3151_v61 = vadd.f32 %v3150_v27, %v3149_v11 }
 0x29a   : > { %v3152_v38 = vpop.f32.mrf.mxu1  ;;  %v3434_v35 = vpop.f32.mrf.mxu0 }
 0x29b   : > { %v5385_v36 = vadd.f32 %v3427_v37, %v3151_v61 }
 0x29c   : > { %v3153_v49 = vpop.f32.mrf.mxu1  ;;  %v1509_v25 = vpop.f32.mrf.mxu0 }
 0x29d   : > { %v3154_v47 = vadd.f32 %v3153_v49, %v3152_v38 }
 0x29e   : > { %v3155_v31 = vpop.f32.mrf.mxu1  ;;  %v3435_v30 = vpop.f32.mrf.mxu0 }
 0x29f   : > { %v5387_v51 = vadd.f32 %v3154_v47, %v1493_v7 }
 0x2a0   : > { %v3156_v40 = vpop.f32.mrf.mxu1  ;;  %v1512_v22 = vpop.f32.mrf.mxu0 }
 0x2a1   : > { %v3157_v8 = vadd.f32 %v3156_v40, %v3155_v31 }
 0x2a2   : > { %v3158_v3 = vpop.f32.mrf.mxu1  ;;  %v3454_v17 = vpop.f32.mrf.mxu0 }
 0x2a3   : > { %v5389_v63 = vadd.f32 %v3157_v8, %v1496_v50 }
 0x2a4   : > { %v3159_v56 = vpop.f32.mrf.mxu1  ;;  %v1799_v45 = vpop.f32.mrf.mxu0 }
 0x2a5   : > { %v3160_v55 = vadd.f32 %v3159_v56, %v3158_v3 }
 0x2a6   : > { %v3161_v5 = vpop.f32.mrf.mxu1  ;;  %v3455_v58 = vpop.f32.mrf.mxu0 }
 0x2a7   : > { %v5391_v59 = vadd.f32 %v3430_v16, %v3160_v55 }
 0x2a8   : > { %v3162_v21 = vpop.f32.mrf.mxu1  ;;  %v1802_v19 = vpop.f32.mrf.mxu0 }
 0x2a9   : > { %v3163_v32 = vadd.f32 %v3162_v21, %v3161_v5 }
 0x2aa   : > { %v3164_v20 = vpop.f32.mrf.mxu1  ;;  %v5395_v12 = vpop.f32.mrf.mxu0 }
 0x2ab   : > { %v5393_v57 = vadd.f32 %v3431_v26, %v3163_v32 }
 0x2ac   : > { %v3165_v24 = vpop.f32.mrf.mxu1  ;;  %v1815_v4 = vpop.f32.mrf.mxu0 }
 0x2ad   : > { %v3166_v48 = vadd.f32 %v3165_v24, %v3164_v20 }
 0x2ae   : > { %v3167_v1 = vpop.f32.mrf.mxu1  ;;  %v5399_v52 = vpop.f32.mrf.mxu0 }
 0x2af   : > { %v5397_v6 = vadd.f32 %v3166_v48, %v1509_v25 }
 0x2b0   : > { %v3168_v44 = vpop.f32.mrf.mxu1  ;;  %v1818_v15 = vpop.f32.mrf.mxu0 }
 0x2b1   : > { %v3169_v60 = vadd.f32 %v3168_v44, %v3167_v1 }
 0x2b2   : > { %v3170_v62 = vpop.f32.mrf.mxu1  ;;  %v5403_v42 = vpop.f32.mrf.mxu0 }
 0x2b3   : > { %v5401_v39 = vadd.f32 %v3169_v60, %v1512_v22 }
 0x2b4   : > { %v3171_v13 = vpop.f32.mrf.mxu1  ;;  %v5405_v53 = vpop.f32.mrf.mxu0 }
 0x2b5   : > { %v3172_v14 = vadd.f32 %v3171_v13, %v3170_v62 }
 0x2b6   : > { %v3173_v29 = vpop.f32.mrf.mxu1  ;;  %v5409_v34 = vpop.f32.mrf.mxu0 }
 0x2b7   : > { %v5407_v37 = vadd.f32 %v3434_v35, %v3172_v14 }
 0x2b8   : > { %v3174_v54 = vpop.f32.mrf.mxu1  ;;  %v5411_v10 = vpop.f32.mrf.mxu0 }
 0x2b9   : > { %v3175_v18 = vadd.f32 %v3174_v54, %v3173_v29 }
 0x2ba   : > { %v3208_v16 = vpop.f32.mrf.mxu1  ;;  %v5415_v0 = vpop.f32.mrf.mxu0 }
 0x2bb   : > { %v5413_v43 = vadd.f32 %v3435_v30, %v3175_v18 }
 0x2bc   : > { %v3209_v7 = vpop.f32.mrf.mxu1  ;;  %v5417_v26 = vpop.f32.mrf.mxu0 }
 0x2bd   : > { %v3210_v11 = vadd.f32 %v3209_v7, %v3208_v16 }
 0x2be   : > { %v3211_v27 = vpop.f32.mrf.mxu1  ;;  %v5420_v50 = vpop.f32.mrf.mxu0 }
 0x2bf   : > { %v1703_v61 = vadd.f32 %v3210_v11, %v5371_v2 }
 0x2c0   : > { %v3212_v38 = vpop.f32.mrf.mxu1  ;;  %v5422_v49 = vpop.f32.mrf.mxu0 }
 0x2c1   : > { %v3213_v35 = vadd.f32 %v3212_v38, %v3211_v27  ;;  %v5424_v47 = vadd.f32 %v1799_v45, %v1703_v61 }
 0x2c2   : > { %v3214_v25 = vpop.f32.mrf.mxu1 }
 0x2c3   : > { %v1706_v31 = vadd.f32 %v3213_v35, %v5375_v28  ;;  %v5427_v30 = vpop.f32.mrf.mxu0 }
 0x2c4   : > { %v3215_v40 = vpop.f32.mrf.mxu1 }
 0x2c5   : > { %v3216_v8 = vadd.f32 %v3215_v40, %v3214_v25  ;;  %v5429_v22 = vpop.f32.mrf.mxu0  ;;  %v5431_v3 = vadd.f32 %v1802_v19, %v1706_v31 }
 0x2c6   : > { %v3217_v2 = vpop.f32.mrf.mxu1 }
 0x2c7   : > { %v1711_v56 = vadd.f32 %v3216_v8, %v5373_v23  ;;  %v5434_v55 = vpop.f32.mrf.mxu0 }
 0x2c8   : > { %v3218_v5 = vpop.f32.mrf.mxu1 }
 0x2c9   : > { %v3219_v21 = vadd.f32 %v3218_v5, %v3217_v2  ;;  %v5436_v45 = vpop.f32.mrf.mxu0  ;;  %v5438_v32 = vadd.f32 %v3454_v17, %v1711_v56 }
 0x2ca   : > { %v3220_v28 = vpop.f32.mrf.mxu1 }
 0x2cb   : > { %v1714_v20 = vadd.f32 %v3219_v21, %v5377_v33  ;;  %v5441_v24 = vpop.f32.mrf.mxu0 }
 0x2cc   : > { %v3221_v48 = vpop.f32.mrf.mxu1 }
 0x2cd   : > { %v3222_v1 = vadd.f32 %v3221_v48, %v3220_v28  ;;  %v5443_v19 = vpop.f32.mrf.mxu0  ;;  %v5445_v44 = vadd.f32 %v3455_v58, %v1714_v20 }
 0x2ce   : > { %v3223_v23 = vpop.f32.mrf.mxu1 }
 0x2cf   : > { %v1719_v60 = vadd.f32 %v3222_v1, %v5379_v41  ;;  %v5448_v62 = vpop.f32.mrf.mxu0 }
 0x2d0   : > { %v3224_v13 = vpop.f32.mrf.mxu1 }
 0x2d1   : > { %v3225_v14 = vadd.f32 %v3224_v13, %v3223_v23  ;;  %v5450_v17 = vpop.f32.mrf.mxu0  ;;  %v5452_v29 = vadd.f32 %v1815_v4, %v1719_v60 }
 0x2d2   : > { %v3226_v33 = vpop.f32.mrf.mxu1 }
 0x2d3   : > { %v1722_v54 = vadd.f32 %v3225_v14, %v5381_v9  ;;  %v5455_v18 = vpop.f32.mrf.mxu0 }
 0x2d4   : > { %v3227_v16 = vpop.f32.mrf.mxu1 }
 0x2d5   : > { %v3228_v7 = vadd.f32 %v3227_v16, %v3226_v33  ;;  %v5457_v58 = vpop.f32.mrf.mxu0  ;;  %v5459_v11 = vadd.f32 %v1818_v15, %v1722_v54 }
 0x2d6   : > { %v3229_v41 = vpop.f32.mrf.mxu1 }
 0x2d7   : > { %v1727_v27 = vadd.f32 %v3228_v7, %v5383_v46  ;;  %v5462_v61 = vpop.f32.mrf.mxu0 }
 0x2d8   : > { %v3230_v38 = vpop.f32.mrf.mxu1 }
 0x2d9   : > { %v3231_v35 = vadd.f32 %v3230_v38, %v3229_v41  ;;  %v5464_v4 = vpop.f32.mrf.mxu0  ;;  %v5467_v25 = vadd.f32 %v5395_v12, %v1727_v27 }
 0x2da   : > { %v3232_v9 = vpop.f32.mrf.mxu1 }
 0x2db   : > { %v1730_v31 = vadd.f32 %v3231_v35, %v5385_v36  ;;  %v5470_v40 = vpop.f32.mrf.mxu0 }
 0x2dc   : > { %v3233_v8 = vpop.f32.mrf.mxu1 }
 0x2dd   : > { %v3234_v15 = vadd.f32 %v3233_v8, %v3232_v9  ;;  %v5472_v2 = vpop.f32.mrf.mxu0  ;;  %v5475_v46 = vadd.f32 %v5399_v52, %v1730_v31 }
 0x2de   : > { %v3235_v56 = vpop.f32.mrf.mxu1 }
 0x2df   : > { %v1735_v5 = vadd.f32 %v3234_v15, %v5387_v51  ;;  %v5478_v21 = vpop.f32.mrf.mxu0 }
 0x2e0   : > { %v3236_v28 = vpop.f32.mrf.mxu1 }
 0x2e1   : > { %v3237_v12 = vadd.f32 %v3236_v28, %v3235_v56  ;;  %v5480_v20 = vpop.f32.mrf.mxu0  ;;  %v5483_v36 = vadd.f32 %v5405_v53, %v1735_v5 }
 0x2e2   : > { %v3238_v48 = vpop.f32.mrf.mxu1 }
 0x2e3   : > { %v1738_v1 = vadd.f32 %v3237_v12, %v5389_v63  ;;  %v5486_v23 = vpop.f32.mrf.mxu0 }
 0x2e4   : > { %v3239_v60 = vpop.f32.mrf.mxu1 }
 0x2e5   : > { %v3240_v52 = vadd.f32 %v3239_v60, %v3238_v48  ;;  %v5488_v13 = vpop.f32.mrf.mxu0  ;;  %v5491_v51 = vadd.f32 %v5411_v10, %v1738_v1 }
 0x2e6   : > { %v3241_v14 = vpop.f32.mrf.mxu1 }
 0x2e7   : > { %v1743_v33 = vadd.f32 %v3240_v52, %v5391_v59  ;;  %v5494_v54 = vpop.f32.mrf.mxu0 }
 0x2e8   : > { %v3242_v16 = vpop.f32.mrf.mxu1 }
 0x2e9   : > { %v3243_v53 = vadd.f32 %v3242_v16, %v3241_v14  ;;  %v5496_v7 = vpop.f32.mrf.mxu0  ;;  %v5499_v63 = vadd.f32 %v5403_v42, %v1743_v33  ;;  %v3296_v33 = vadd.f32 %v5443_v19, %v5441_v24 }
 0x2ea   : > { %v3244_v41 = vpop.f32.mrf.mxu1 }
 0x2eb   : > { %v1746_v27 = vadd.f32 %v3243_v53, %v5393_v57  ;;  %v5502_v38 = vpop.f32.mrf.mxu0 }
 0x2ec   : > { %v3245_v35 = vpop.f32.mrf.mxu1 }
 0x2ed   : > { %v3246_v10 = vadd.f32 %v3245_v35, %v3244_v41  ;;  %v5504_v9 = vpop.f32.mrf.mxu0  ;;  %v5507_v59 = vadd.f32 %v5409_v34, %v1746_v27  ;;  %v3290_v41 = vadd.f32 %v5429_v22, %v5427_v30 }
 0x2ee   : > { %v3247_v31 = vpop.f32.mrf.mxu1 }
 0x2ef   : > { %v1751_v8 = vadd.f32 %v3246_v10, %v5397_v6  ;;  %v5510_v15 = vpop.f32.mrf.mxu0 }
 0x2f0   : > { %v3248_v56 = vpop.f32.mrf.mxu1 }
 0x2f1   : > { %v3249_v42 = vadd.f32 %v3248_v56, %v3247_v31  ;;  %v5512_v5 = vpop.f32.mrf.mxu0  ;;  %v5515_v57 = vadd.f32 %v5417_v26, %v1751_v8 }
 0x2f2   : > { %v3250_v28 = vpop.f32.mrf.mxu1 }
 0x2f3   : > { %v1754_v12 = vadd.f32 %v3249_v42, %v5401_v39  ;;  %v5518_v1 = vpop.f32.mrf.mxu0 }
 0x2f4   : > { %v3251_v48 = vpop.f32.mrf.mxu1 }
 0x2f5   : > { %v3252_v34 = vadd.f32 %v3251_v48, %v3250_v28  ;;  %v5521_v60 = vadd.f32 %v5422_v49, %v1754_v12  ;;  %v5526_v16 = vpop.f32.mrf.mxu0  ;;  %v3302_v28 = vadd.f32 %v5457_v58, %v5455_v18 }
 0x2f6   : > { %v3253_v6 = vpop.f32.mrf.mxu1 }
 0x2f7   : > { %v1759_v52 = vadd.f32 %v3252_v34, %v5407_v37  ;;  %v3299_v37 = vadd.f32 %v5450_v17, %v5448_v62  ;;  %v5536_v10 = vpop.f32.mrf.mxu0 }
 0x2f8   : > { %v3254_v14 = vpop.f32.mrf.mxu1 }
 0x2f9   : > { %v3255_v26 = vadd.f32 %v3254_v14, %v3253_v6  ;;  %v5529_v53 = vadd.f32 %v5415_v0, %v1759_v52  ;;  %v5545_v0 = vld [vmem:[%s5983_s29] ss:$0 sm:$0xff]  ;;  %v5552_v8 = vpop.f32.mrf.mxu0 }
 0x2fa   : > { %v3486_v39 = vpop.f32.mrf.mxu1 }
 0x2fb   : > { %v1762_v49 = vadd.f32 %v3255_v26, %v5413_v43  ;;  %v2195_v27 = vadd.f32 %v3486_v39, %v3296_v33  ;;  %v3293_v43 = vadd.f32 %v5436_v45, %v5434_v55  ;;  %v3305_v33 = vadd.f32 %v5464_v4, %v5462_v61 }
 0x2fc   : > { %v2186_v35 = vpop.f32.mrf.mxu1  ;;  %v3314_v61 = vadd.f32 %v5488_v13, %v5486_v23  ;;  %v3317_v13 = vadd.f32 %v5496_v7, %v5494_v54 }
 0x2fd   : > { %v2251_v24 = vadd.f32 %v2195_v27, %v5438_v32  ;;  %v2187_v19 = vadd.f32 %v3290_v41, %v2186_v35  ;;  %v5540_v31 = vadd.f32 %v5420_v50, %v1762_v49  ;;  %v3308_v32 = vadd.f32 %v5472_v2, %v5470_v40  ;;  %v3330_v40 = vpop.f32.mrf.mxu0 }
 0x2fe   : > { %v3487_v30 = vpop.f32.mrf.mxu1  ;;  %v3320_v35 = vadd.f32 %v5504_v9, %v5502_v38  ;;  %v3323_v9 = vadd.f32 %v5512_v5, %v5510_v15 }
 0x2ff   : > { %v2249_v22 = vadd.f32 %v2187_v19, %v5424_v47  ;;  %v2198_v62 = vadd.f32 %v3487_v30, %v3299_v37  ;;  %v2274_v50 = vadd.f32 %v5545_v0, %v2251_v24  ;;  %v3331_v37 = vpop.f32.mrf.mxu0 }
 0x300   : > { %v2189_v17 = vpop.f32.mrf.mxu1  ;;  %v3332_v15 = vadd.f32 %v3331_v37, %v3330_v40 }
 0x301   : > { %v2252_v56 = vadd.f32 %v2198_v62, %v5445_v44  ;;  %v2190_v42 = vadd.f32 %v3293_v43, %v2189_v17  ;;  %v2272_v55 = vadd.f32 %v5545_v0, %v2249_v22  ;;  %v2290_v2 = vmax.f32 %v2274_v50, 0.0  ;;  %v3333_v22 = vpop.f32.mrf.mxu0 }
 0x302   : > { %v3490_v12 = vpop.f32.mrf.mxu1  ;;  %v3311_v44 = vadd.f32 %v5480_v20, %v5478_v21 }
 0x303   : > { %v2275_v47 = vadd.f32 %v5545_v0, %v2252_v56  ;;  %v2250_v45 = vadd.f32 %v2190_v42, %v5431_v3  ;;  %v2211_v48 = vadd.f32 %v3490_v12, %v3308_v32  ;;  %v2288_v26 = vmax.f32 %v2272_v55, 0.0  ;;  %v3334_v5 = vpop.f32.mrf.mxu0 }
 0x304   : > { %v2202_v34 = vpop.f32.mrf.mxu1 }
 0x305   : > { %v2291_v6 = vmax.f32 %v2275_v47, 0.0  ;;  %v2273_v52 = vadd.f32 %v5545_v0, %v2250_v45  ;;  %v2203_v14 = vadd.f32 %v3302_v28, %v2202_v34  ;;  %v2255_v18 = vadd.f32 %v2211_v48, %v5467_v25 }
 0x306   : > { %v3491_v58 = vpop.f32.mrf.mxu1 }
 0x307   : > { %v2305_v39 = vpack.c.bf16 %v2291_v6, %v2290_v2  ;;  %v2289_v3 = vmax.f32 %v2273_v52, 0.0  ;;  %v2253_v41 = vadd.f32 %v2203_v14, %v5452_v29  ;;  %v2214_v49 = vadd.f32 %v3491_v58, %v3311_v44 }
 0x308   : > { %v2205_v27 = vpop.f32.mrf.mxu1  ;;  %v2278_v21 = vadd.f32 %v5545_v0, %v2255_v18  ;;  %v3326_v2 = vadd.f32 %v5526_v16, %v5518_v1  ;;  %v3335_v52 = vadd.f32 %v3334_v5, %v3333_v22  ;;  %v3329_v1 = vadd.f32 %v5552_v8, %v5536_v10  ;;  %v3811_v22 = vld [vmem:[%s4530_s26] sm:$0xff]  ;;  %v3814_v5 = vld [vmem:[%s4530_s26 + $0x30] sm:$0xff] }
 0x309   : > { %v2206_v24 = vadd.f32 %v3305_v33, %v2205_v27  ;;  %v2304_v19 = vpack.c.bf16 %v2289_v3, %v2288_v26  ;;  %v2256_v25 = vadd.f32 %v2214_v49, %v5475_v46  ;;  %v2276_v29 = vadd.f32 %v5545_v0, %v2253_v41 }
 0x30a   : > { %v3494_v20 = vpop.f32.mrf.mxu1  ;;  %v2294_v17 = vmax.f32 %v2278_v21, 0.0 }
 0x30b   : > { %v2254_v4 = vadd.f32 %v2206_v24, %v5459_v11  ;;  %v2227_v30 = vadd.f32 %v3494_v20, %v3320_v35  ;;  %3516 = vmatprep.mubr.bf16.mxu0 %v2304_v19  ;;  %v2279_v43 = vadd.f32 %v5545_v0, %v2256_v25  ;;  %v2292_v42 = vmax.f32 %v2276_v29, 0.0 }
 0x30c   : > { %v2218_v38 = vpop.f32.mrf.mxu1  ;;  %3517 = vmatmul.mubr.bf16.vlgmr.msra.gmra.mxu0 %v2305_v39 }
 0x30d   : > { %v2277_v46 = vadd.f32 %v5545_v0, %v2254_v4  ;;  %v2219_v62 = vadd.f32 %v3314_v61, %v2218_v38  ;;  %v2295_v32 = vmax.f32 %v2279_v43, 0.0  ;;  %v2259_v23 = vadd.f32 %v2227_v30, %v5499_v63  ;;  %v5605_v61 = vld [vmem:[%s5984_s12] ss:$0 sm:$0xff] }
 0x30e   : > { %v3495_v11 = vpop.f32.mrf.mxu1 }
 0x30f   : > { %v2293_v50 = vmax.f32 %v2277_v46, 0.0  ;;  %v2230_v56 = vadd.f32 %v3495_v11, %v3323_v9  ;;  %v2307_v28 = vpack.c.bf16 %v2295_v32, %v2294_v17  ;;  %v2257_v12 = vadd.f32 %v2219_v62, %v5483_v36 }
 0x310   : > { %v2221_v55 = vpop.f32.mrf.mxu1  ;;  %v2282_v48 = vadd.f32 %v5545_v0, %v2259_v23  ;;  %v3812_v23 = vld [vmem:[%s4530_s26 + $0x18] sm:$0xff] }
 0x311   : > { %v2260_v47 = vadd.f32 %v2230_v56, %v5507_v59  ;;  %v2222_v45 = vadd.f32 %v3317_v13, %v2221_v55  ;;  %v2306_v63 = vpack.c.bf16 %v2293_v50, %v2292_v42  ;;  %v2280_v36 = vadd.f32 %v5545_v0, %v2257_v12  ;;  %v3813_v56 = vld [vmem:[%s4530_s26 + $0x8] sm:$0xff] }
 0x312   : > { %v3498_v34 = vpop.f32.mrf.mxu1  ;;  %v2298_v58 = vmax.f32 %v2282_v48, 0.0 }
 0x313   : > { %v2283_v54 = vadd.f32 %v5545_v0, %v2260_v47  ;;  %v2258_v7 = vadd.f32 %v2222_v45, %v5491_v51  ;;  %v2243_v6 = vadd.f32 %v3498_v34, %v3332_v15  ;;  %3520 = vmatprep.mubr.bf16.mxu1 %v2306_v63  ;;  %v2296_v39 = vmax.f32 %v2280_v36, 0.0  ;;  %v3815_v63 = vld [vmem:[%s4530_s26 + $0x20] sm:$0xff] }
 0x314   : > { %v2234_v40 = vpop.f32.mrf.mxu1  ;;  %3521 = vmatmul.mubr.bf16.vlgmr.msra.gmra.mxu1 %v2307_v28 }
 0x315   : > { %v2299_v14 = vmax.f32 %v2283_v54, 0.0  ;;  %v2281_v59 = vadd.f32 %v5545_v0, %v2258_v7  ;;  %v2263_v44 = vadd.f32 %v2243_v6, %v5529_v53  ;;  %v2235_v18 = vadd.f32 %v3326_v2, %v2234_v40 }
 0x316   : > { %v3499_v33 = vpop.f32.mrf.mxu1 }
 0x317   : > { %v2297_v16 = vmax.f32 %v2281_v59, 0.0  ;;  %v2261_v51 = vadd.f32 %v2235_v18, %v5515_v57  ;;  %v2246_v26 = vadd.f32 %v3499_v33, %v3335_v52  ;;  %v2309_v41 = vpack.c.bf16 %v2299_v14, %v2298_v58  ;;  %v3816_v52 = vld [vmem:[%s4530_s26 + $0x38] sm:$0xff] }
 0x318   : > { %v2237_v3 = vpop.f32.mrf.mxu1  ;;  %v2286_v49 = vadd.f32 %v5545_v0, %v2263_v44  ;;  %v3817_v44 = vld [vmem:[%s4530_s26 + $0x28] sm:$0xff] }
 0x319   : > { %v2264_v27 = vadd.f32 %v2246_v26, %v5540_v31  ;;  %v2238_v35 = vadd.f32 %v3329_v1, %v2237_v3  ;;  %v2308_v53 = vpack.c.bf16 %v2297_v16, %v2296_v39  ;;  %v2284_v37 = vadd.f32 %v5545_v0, %v2261_v51  ;;  %v3818_v16 = vld [vmem:[%s4530_s26 + $0x50] sm:$0xff] }
 0x31a   : > { %v2302_v10 = vmax.f32 %v2286_v49, 0.0 }
 0x31b   : > { %v2287_v24 = vadd.f32 %v5545_v0, %v2264_v27  ;;  %v2262_v19 = vadd.f32 %v2238_v35, %v5521_v60  ;;  %3524 = vmatprep.mubr.bf16.mxu1 %v2308_v53  ;;  %v2300_v21 = vmax.f32 %v2284_v37, 0.0  ;;  %v3820_v37 = vld [vmem:[%s4530_s26 + $0x58] sm:$0xff] }
 0x31c   : > { %3525 = vmatmul.mubr.bf16.gmra.mxu1 %v2309_v41  ;;  %v3819_v41 = vld [vmem:[%s4530_s26 + $0x40] sm:$0xff] }
 0x31d   : > { %v2303_v57 = vmax.f32 %v2287_v24, 0.0  ;;  %v2285_v8 = vadd.f32 %v5545_v0, %v2262_v19  ;;  %v3810_v0 = vld [vmem:[%s4530_s26 + $0x10] sm:$0xff] }
 0x31f   : > { %v2301_v25 = vmax.f32 %v2285_v8, 0.0  ;;  %v2311_v20 = vpack.c.bf16 %v2303_v57, %v2302_v10  ;;  %v3821_v8 = vld [vmem:[%s4530_s26 + $0x48] sm:$0xff] }
 0x321   : > { %v2310_v31 = vpack.c.bf16 %v2301_v25, %v2300_v21 }
 0x323   : > { %3528 = vmatprep.mubr.bf16.mxu1 %v2310_v31 }
 0x324   : > { %3529 = vmatmul.mubr.bf16.gmra.mxu1 %v2311_v20 }
 0x3cc   : > { %v3518_v60 = vpop.f32.mrf.mxu0 }
 0x3cd   : > { %v2426_v4 = vadd.f32 %v3518_v60, %v5605_v61  ;;  %v3822_v60 = vld [vmem:[%s4530_s26 + $0x70] sm:$0xff] }
 0x3ce   : > { %v2417_v30 = vpop.f32.mrf.mxu0 }
 0x3cf   : > { %v2482_v29 = vadd.f32 %v3810_v0, %v2426_v4  ;;  %v2418_v43 = vadd.f32 %v5605_v61, %v2417_v30 }
 0x3d0   : > { %v3519_v38 = vpop.f32.mrf.mxu0 }
 0x3d1   : > { %v2498_v9 = vmax.f32 %v2482_v29, 0.0  ;;  %v2480_v46 = vadd.f32 %v3811_v22, %v2418_v43  ;;  %v2429_v62 = vadd.f32 %v3519_v38, %v5605_v61  ;;  %v3823_v43 = vld [vmem:[%s4530_s26 + $0x60] sm:$0xff] }
 0x3d2   : > { %v2420_v17 = vpop.f32.mrf.mxu0 }
 0x3d3   : > { %2514 = vst [vmem:[%s5613_s9 + $0x10] sm:$0xff] %v2498_v9  ;;  %v2496_v32 = vmax.f32 %v2480_v46, 0.0  ;;  %v2483_v11 = vadd.f32 %v3812_v23, %v2429_v62  ;;  %v2421_v13 = vadd.f32 %v5605_v61, %v2420_v17  ;;  %v3824_v62 = vld [vmem:[%s4530_s26 + $0x78] sm:$0xff] }
 0x3d4   : > { %v3522_v28 = vpop.f32.mrf.mxu1 }
 0x3d5   : > { %2512 = vst [vmem:[%s5613_s9] sm:$0xff] %v2496_v32  ;;  %v2499_v50 = vmax.f32 %v2483_v11, 0.0  ;;  %v2481_v42 = vadd.f32 %v3813_v56, %v2421_v13  ;;  %v2442_v12 = vadd.f32 %v3522_v28, %v5605_v61  ;;  %v3825_v11 = vld [vmem:[%s4530_s26 + $0x68] sm:$0xff]  ;;  %s4161_s26 = smov [#allocation13]  }
 0x3d6   : > { %v2433_v15 = vpop.f32.mrf.mxu1  ;;  %s3992_s24 = sshll.u32 %s4161_s26, 4  ;;  %s3993_s24 = int_to_ptr.vmem [resolvable:$false] %s3992_s24 }
 0x3d7   : > { %2515 = vst [vmem:[%s5613_s9 + $0x18] sm:$0xff] %v2499_v50  ;;  %v2497_v55 = vmax.f32 %v2481_v42, 0.0  ;;  %v2486_v47 = vadd.f32 %v3814_v5, %v2442_v12  ;;  %v2434_v45 = vadd.f32 %v5605_v61, %v2433_v15  ;;  %s3994_s29 = scalar_lea.vmem %s3993_s24, 4096  ;;  %p3995_p7 = scmp.lt.s32.totalorder %s5659_s15, %s3993_s24 }
 0x3d8   : > { %v3523_v48 = vpop.f32.mrf.mxu1  ;;  %p3996_p2 = scmp.lt.s32.totalorder %s3994_s29, %s3988_s5 }
 0x3d9   : > { %2513 = vst [vmem:[%s5613_s9 + $0x8] sm:$0xff] %v2497_v55  ;;  %v2502_v34 = vmax.f32 %v2486_v47, 0.0  ;;  %v2484_v2 = vadd.f32 %v3815_v63, %v2434_v45  ;;  %v2445_v54 = vadd.f32 %v3523_v48, %v5605_v61 }
 0x3da   : > { %v2436_v7 = vpop.f32.mrf.mxu1  ;;  %p3997_p8 = por %p3996_p2, %p3995_p7 }
 0x3db   : > { %2518 = vst [vmem:[%s5613_s9 + $0x30] sm:$0xff] %v2502_v34  ;;  %v2500_v6 = vmax.f32 %v2484_v2, 0.0  ;;  %v2487_v36 = vadd.f32 %v3816_v52, %v2445_v54  ;;  %v2437_v40 = vadd.f32 %v5605_v61, %v2436_v7 }
 0x3dc   : > { %v3526_v14 = vpop.f32.mrf.mxu1  ;;  %p3998_p5 = pnand %p3997_p8, %p3991_p0 }
 0x3dd   : > { %2516 = vst [vmem:[%s5613_s9 + $0x20] sm:$0xff] %v2500_v6  ;;  %v2503_v59 = vmax.f32 %v2487_v36, 0.0  ;;  %v2485_v18 = vadd.f32 %v3817_v44, %v2437_v40  ;;  %v2458_v58 = vadd.f32 %v3526_v14, %v5605_v61 }
 0x3de   : > { %v2449_v33 = vpop.f32.mrf.mxu1 }
 0x3df   : > { %2519 = vst [vmem:[%s5613_s9 + $0x38] sm:$0xff] %v2503_v59  ;;  %v2501_v1 = vmax.f32 %v2485_v18, 0.0  ;;  %v2490_v51 = vadd.f32 %v3818_v16, %v2458_v58  ;;  %v2450_v26 = vadd.f32 %v5605_v61, %v2449_v33 }
 0x3e0   : > { %v3527_v39 = vpop.f32.mrf.mxu1 }
 0x3e1   : > { %2517 = vst [vmem:[%s5613_s9 + $0x28] sm:$0xff] %v2501_v1  ;;  %v2506_v3 = vmax.f32 %v2490_v51, 0.0  ;;  %v2488_v49 = vadd.f32 %v3819_v41, %v2450_v26  ;;  %v2461_v27 = vadd.f32 %v3527_v39, %v5605_v61 }
 0x3e2   : > { %v2452_v35 = vpop.f32.mrf.mxu1 }
 0x3e3   : > { %2522 = vst [vmem:[%s5613_s9 + $0x50] sm:$0xff] %v2506_v3  ;;  %v2504_v53 = vmax.f32 %v2488_v49, 0.0  ;;  %v2491_v24 = vadd.f32 %v3820_v37, %v2461_v27  ;;  %v2453_v19 = vadd.f32 %v5605_v61, %v2452_v35 }
 0x3e4   : > { %v3530_v10 = vpop.f32.mrf.mxu1 }
 0x3e5   : > { %2520 = vst [vmem:[%s5613_s9 + $0x40] sm:$0xff] %v2504_v53  ;;  %v2507_v57 = vmax.f32 %v2491_v24, 0.0  ;;  %v2489_v21 = vadd.f32 %v3821_v8, %v2453_v19  ;;  %v2474_v25 = vadd.f32 %v3530_v10, %v5605_v61 }
 0x3e6   : > { %v2465_v20 = vpop.f32.mrf.mxu1 }
 0x3e7   : > { %2523 = vst [vmem:[%s5613_s9 + $0x58] sm:$0xff] %v2507_v57  ;;  %v2505_v31 = vmax.f32 %v2489_v21, 0.0  ;;  %v2494_v4 = vadd.f32 %v3822_v60, %v2474_v25  ;;  %v2466_v30 = vadd.f32 %v5605_v61, %v2465_v20 }
 0x3e8   : > { %v3531_v0 = vpop.f32.mrf.mxu1 }
 0x3e9   : > { %2521 = vst [vmem:[%s5613_s9 + $0x48] sm:$0xff] %v2505_v31  ;;  %v2510_v29 = vmax.f32 %v2494_v4, 0.0  ;;  %v2492_v38 = vadd.f32 %v3823_v43, %v2466_v30  ;;  %v2477_v9 = vadd.f32 %v3531_v0, %v5605_v61 }
 0x3ea   : > { %v2468_v22 = vpop.f32.mrf.mxu1 }
 0x3eb   : > { %2526 = vst [vmem:[%s5613_s9 + $0x70] sm:$0xff] %v2510_v29  ;;  %v2508_v46 = vmax.f32 %v2492_v38, 0.0  ;;  %v2495_v17 = vadd.f32 %v3824_v62, %v2477_v9  ;;  %v2469_v32 = vadd.f32 %v5605_v61, %v2468_v22 }
 0x3ed   : > { %2524 = vst [vmem:[%s5613_s9 + $0x60] sm:$0xff] %v2508_v46  ;;  %v2511_v23 = vmax.f32 %v2495_v17, 0.0  ;;  %v2493_v13 = vadd.f32 %v3825_v11, %v2469_v32 }
 0x3ef   : > { %2527 = vst [vmem:[%s5613_s9 + $0x78] sm:$0xff] %v2511_v23  ;;  %v2509_v50 = vmax.f32 %v2493_v13, 0.0 }
 0x3f1   : > { %2525 = vst [vmem:[%s5613_s9 + $0x68] sm:$0xff] %v2509_v50 }
 0x3f2   : > { %4001 = shalt.err (!%p3998_p5)
}
 0x3f3   : > { %s4002_s27 = scalar_lea.hbm %s5665_s30, 2048  ;;  %s4006_s28 = scalar_lea.hbm %s5987_s8, 8192 }
 0x3f4   : > { %p4003_p1 = scmp.ne.s32.totalorder %s5665_s30, %s4002_s27  ;;  %p4007_p6 = scmp.lt.s32.totalorder %s5665_s30, %s5987_s8 }
 0x3f5   : > { %p4008_p13 = scmp.lt.s32.totalorder %s4006_s28, %s4002_s27 }
 0x3f6   : > { %p4004_p4 = pnand %p4003_p1, %p5988_p11 }
 0x3f7   : > { %p4009_p3 = por %p4008_p13, %p4007_p6 }
 0x3f8   : > { %p4005_p10 = pneg %p4004_p4 }
 0x3fa   : > { %p4010_p9 = pnand %p4009_p3, %p4005_p10 }
 0x3fc   : > { %4013 = shalt.err (!%p4010_p9)
}
 0x3fd   : > { %s4162_s10 = smov 128   ;;  %s4163_s25 = smov 8  }
 0x3fe   : > { %3566 = dma.vmem_to_hbm [thread:$0]  (%p5988_p11), %s5659_s15, 2048, %s5665_s30, %s5670_s1, %s4162_s10, %s4162_s10, %s4163_s25  }
 0x3ff PF: > { %s5989_s18 = sld [smem:[#allocation23_spill]]  ;;  %p3599_p12 = scmp.ge.s32.totalorder %s4148_s22, 2 }
 0x400   : > { %s5990_s23 = sld [smem:[#allocation31_spill]] }
 0x405   : > { %s2559_s19 = sand.u32 1, %s5989_s18  }
 0x406   : > { %p5991_p0 = scmp.ne.s32.totalorder %s5990_s23, 0  ;;  %s2560_s11 = scalar_lea.sflag [#allocation4], %s2559_s19 }
 0x408   : > { %p3589_p7 = pnand %p3599_p12, %p5991_p0 }
 0x40a   : > { %p3590_p2 = pneg %p3589_p7 }
 0x40c   : > { %4091 = dma.done.wait (%p3590_p2), %s2560_s11, 2048  }
 0x40d   : > { %4093 = vsyncadd (%p3590_p2), %s2560_s11, 4294965248  ;;  %s30_s22 = sadd.s32 1, %s4148_s22   ;;  %s5993_s30 = sld [smem:[#allocation21_spill]] }
 0x40e   : > { %p5698_p8 = scmp.ge.s32.totalorder %s30_s22, 6   ;;  %s5994_s10 = sld [smem:[#allocation22_spill]] }
 0x40f   : > { %s5995_s12 = sld [smem:[#allocation24_spill]]  ;;  %s5998_s11 = smov %s6023_s3 }
 0x410   : > { %s5996_s1 = sld [smem:[#allocation28_spill]]  ;;  %s5999_s13 = smov %s4116_s14 }
 0x411   : > { %s5997_s5 = sld [smem:[#allocation32_spill]]  ;;  %s6000_s14 = smov %s4445_s4 }
 0x412   : > { %s6001_s15 = smov %s4124_s16  ;;  %s6002_s16 = smov %s4128_s17 }
 0x413   : > { %s6003_s17 = smov %s4440_s2  ;;  %s6004_s18 = smov %s4140_s20 }
 0x414   : > { %s6005_s19 = smov %s4144_s21  ;;  %29 = sbr.rel (!%p5698_p8) target bundleno = 25 (0x19), region = 139 }
 0x416   : > { %s6006_s20 = smov %s5996_s1 }
 0x417   : > { %s6007_s21 = smov %s5997_s5 }
 0x419   :  { %2565 = vsyncpa [#allocation3], 1 }
 0x41a   :  { %2567 = vsyncpa [#allocation3 + $0x1], 1 }
 0x41b   :  { %2568 = vsyncpa [#allocation6], 1 }
 0x41c   :  { %2570 = vsyncpa [#allocation6 + $0x1], 1 }
 0x41d   :  { %2571 = vsyncpa [#allocation9], 1 }
 0x41e   :  { %2572 = vsyncpa [#allocation12], 1 }
 0x41f   :  { %2573 = vsyncpa [#allocation4], 1 }
 0x420   :  { %2575 = vsyncpa [#allocation4 + $0x1], 1 }

</bundles_post_ra>
